<compile_context>
chip_gen: v7x
topology: tpu7x:2x2x1
jax: 0.10.0
libtpu: 0.0.40
codegen_flags: <defaults>
</compile_context>

<pallas_src>
import functools
import math

import numpy as np
import jax
import jax.numpy as jnp
from jax.experimental import pallas as pl
from jax.experimental.pallas import tpu as pltpu

D_MODEL = 32
N_HEADS = 4
D_HEAD = D_MODEL // N_HEADS
D_FF = 64
LN_EPS = 1e-5          # torch.nn.LayerNorm default
NEG_INF = -1e9


def _round8(n):
    return -(-n // 8) * 8


def _slab_layout(rows):
    """Row layout of the single parameter/mask slab (every entry 8-row aligned,
    starting at lane 0)."""
    hr = N_HEADS * rows
    width = max(128, hr)
    entries = [
        ("g1", (1, D_MODEL)), ("b1", (1, D_MODEL)),
        ("g2", (1, D_MODEL)), ("b2", (1, D_MODEL)),
        ("bo", (1, D_MODEL)), ("bf2", (1, D_MODEL)), ("bf1", (1, D_FF)),
        ("wo", (D_MODEL, D_MODEL)),
        ("w1", (D_MODEL, D_FF)),
        ("w2", (D_FF, D_MODEL)),
        ("wqT", (D_HEAD, N_HEADS * D_MODEL)),   # stored transposed (lane-dense)
        ("wkT", (D_HEAD, N_HEADS * D_MODEL)),
        ("wvT", (D_HEAD, N_HEADS * D_MODEL)),
        ("bq_p", (hr, D_HEAD)), ("bk_p", (hr, D_HEAD)), ("bv_p", (hr, D_HEAD)),
        ("x_mask", (hr, N_HEADS * D_MODEL)),    # block-diag replication mask
        ("attn_bias", (hr, hr)),                # 0 on (head,batch) blocks, -1e9 off
        ("o_mask", (hr, D_MODEL)),              # head -> feature-block mask
    ]
    layout = {}
    r = 0
    for name, shape in entries:
        layout[name] = (r, shape)
        r += _round8(shape[0])
    return layout, r, width


def pack_param_slab(params, rows, seq):
    """Pack all parameters + head-bookkeeping masks into one VMEM slab.

    Packed row ordering for head-major tensors: r = h*rows + (b*seq + s).
    1/sqrt(Dh) is folded into the Q weight / bias.
    """
    (g1, b1, wq, bq, wk, bk, wv, bv, wo, bo, g2, b2, w1, bf1, w2, bf2) = params
    scale = 1.0 / math.sqrt(D_HEAD)
    hr = N_HEADS * rows

    def w_bigT(w, s=1.0):
        # (D, D) -> (Dh, H*D) with bigT[d, h*D + c] = w[c, h*Dh + d] * s
        w3 = (w * s).reshape(D_MODEL, N_HEADS, D_HEAD)                   # [c,h,d]
        big = jnp.transpose(w3, (1, 0, 2)).reshape(N_HEADS * D_MODEL, D_HEAD)
        return big.T

    def b_packed(b, s=1.0):
        # (1, D) -> (H*rows, Dh)
        bh = (b * s).reshape(N_HEADS, 1, D_HEAD)
        return jnp.broadcast_to(bh, (N_HEADS, rows, D_HEAD)).reshape(hr, D_HEAD)

    # Block-diagonal masks: built once on host (numpy), folded into the slab.
    r_id = np.arange(hr)[:, None]
    x_mask = (r_id // rows == np.arange(N_HEADS * D_MODEL)[None, :] // D_MODEL)
    o_mask = (r_id // rows == np.arange(D_MODEL)[None, :] // D_HEAD)
    same_blk = (r_id // seq) == (np.arange(hr)[None, :] // seq)
    attn_bias = np.where(same_blk, 0.0, NEG_INF).astype(np.float32)

    tensors = {
        "g1": g1, "b1": b1, "g2": g2, "b2": b2, "bo": bo, "bf2": bf2, "bf1": bf1,
        "wo": wo, "w1": w1, "w2": w2,
        "wqT": w_bigT(wq, scale), "wkT": w_bigT(wk), "wvT": w_bigT(wv),
        "bq_p": b_packed(bq, scale), "bk_p": b_packed(bk), "bv_p": b_packed(bv),
        "x_mask": x_mask.astype(np.float32),
        "attn_bias": attn_bias,
        "o_mask": o_mask.astype(np.float32),
    }
    layout, n_rows, width = _slab_layout(rows)
    slab = jnp.zeros((n_rows, width), jnp.float32)
    for name, (r0, shape) in layout.items():
        t = jnp.asarray(tensors[name], jnp.float32).reshape(shape)
        slab = slab.at[r0:r0 + shape[0], 0:shape[1]].set(t)
    return slab, layout


def trans_encoder_kernel(n_layers, rows, layout, x_ref, slab_ref, o_ref):
    f32 = jnp.float32
    hr = N_HEADS * rows

    def rd(name):
        r0, shape = layout[name]
        return slab_ref[r0:r0 + shape[0], 0:shape[1]]

    # ---- loop-invariant loads / broadcasts / transposes (hoisted) ----------
    g1 = jnp.broadcast_to(rd("g1"), (rows, D_MODEL))
    b1 = jnp.broadcast_to(rd("b1"), (rows, D_MODEL))
    g2 = jnp.broadcast_to(rd("g2"), (rows, D_MODEL))
    b2 = jnp.broadcast_to(rd("b2"), (rows, D_MODEL))
    bo = jnp.broadcast_to(rd("bo"), (rows, D_MODEL))
    bf1 = jnp.broadcast_to(rd("bf1"), (rows, D_FF))
    bf2 = jnp.broadcast_to(rd("bf2"), (rows, D_MODEL))
    wo = rd("wo")                 # (D, D)
    w1 = rd("w1")                 # (D, FF)
    w2 = rd("w2")                 # (FF, D)
    wq_big = rd("wqT").T          # (H*D, Dh)  one-time transposes
    wk_big = rd("wkT").T
    wv_big = rd("wvT").T
    bq = rd("bq_p")               # (hr, Dh)
    bk = rd("bk_p")
    bv = rd("bv_p")
    x_mask = rd("x_mask")         # (hr, H*D)
    attn_bias = rd("attn_bias")   # (hr, hr)
    o_mask = rd("o_mask")         # (hr, D)

    def layer_norm(v, g, b):
        mu = jnp.mean(v, axis=-1, keepdims=True)
        var = jnp.mean((v - mu) ** 2, axis=-1, keepdims=True)
        return (v - mu) * jax.lax.rsqrt(var + LN_EPS) * g + b

    def layer(x):
        # ---- sublayer 1: x + MHA(LN(x)) -------------------------------------
        xn = layer_norm(x, g1, b1)                                   # (rows, D)
        # Block-diagonal operand: LN(x) replicated and masked so each of the
        # three projections is ONE (hr,128)x(128,Dh) MXU push, head-major
        # output packed along sublanes (no lane-offset slicing anywhere).
        xw = jnp.concatenate([xn] * N_HEADS, axis=1)                 # (rows, 128)
        xe = jnp.concatenate([xw] * N_HEADS, axis=0) * x_mask        # (hr, 128)
        q = jnp.dot(xe, wq_big, preferred_element_type=f32) + bq     # (hr, Dh)
        k = jnp.dot(xe, wk_big, preferred_element_type=f32) + bk
        v = jnp.dot(xe, wv_big, preferred_element_type=f32) + bv

        # All heads' scores in one matmul; cross-head / cross-batch entries
        # are killed by the additive block mask before the softmax.
        s = jnp.einsum("rd,cd->rc", q, k, preferred_element_type=f32) + attn_bias
        s = s - jnp.max(s, axis=-1, keepdims=True)
        p = jnp.exp(s)
        p = p / jnp.sum(p, axis=-1, keepdims=True)       # exact softmax
        o = jnp.dot(p, v, preferred_element_type=f32)                # (hr, Dh)

        # Output projection: put each head's Dh block on its feature block and
        # hit the full (D, D) Wo in one push, then sum the head row-groups
        # (static, sublane-aligned slices).
        o_bd = jnp.concatenate([o] * N_HEADS, axis=1) * o_mask       # (hr, D)
        z = jnp.dot(o_bd, wo, preferred_element_type=f32)            # (hr, D)
        attn = z[0:rows]
        for h in range(1, N_HEADS):
            attn = attn + z[h * rows:(h + 1) * rows]
        x = x + attn + bo                     # dropout == identity (inference)

        # ---- sublayer 2: x + FFN(LN(x)) --------------------------------------
        xn2 = layer_norm(x, g2, b2)
        h1 = jnp.maximum(jnp.dot(xn2, w1, preferred_element_type=f32) + bf1, 0.0)
        return x + jnp.dot(h1, w2, preferred_element_type=f32) + bf2

    # TODO(synk): optional attention `mask` (None in reference call path) not wired in.
    x = x_ref[...].astype(f32)
    if n_layers <= 4:
        for _ in range(n_layers):             # small N: static unroll
            x = layer(x)
    else:
        x = jax.lax.fori_loop(0, n_layers, lambda _, xx: layer(xx), x)

    # TODO(synk): output last dim is D=32 (<128) => one masked vst per step; a
    # lane-dense (·, S*D) store would need an in-kernel relayout costing more
    # than it saves at this size.
    o_ref[...] = x.astype(o_ref.dtype)


def trans_encoder(x, params, n_layers):
    """TransEncoder.forward: apply the (identical-weight) encoder layer N times."""
    B, S, D = x.shape
    assert D == D_MODEL and D_MODEL % N_HEADS == 0

    # <=2 grid steps: 2 when B is even (one per v7x TensorCore), else fold fully.
    num_steps = 2 if (B >= 2 and B % 2 == 0) else 1
    bc = B // num_steps
    rows = bc * S
    assert rows % 8 == 0, "batch-chunk * seq must be sublane aligned"

    slab, layout = pack_param_slab(params, rows, S)
    x2 = x.reshape(B * S, D)

    x_spec = pl.BlockSpec((rows, D), lambda i: (i, 0))
    out_spec = pl.BlockSpec((rows, D), lambda i: (i, 0))
    try:   # constant index map -> single-buffer the weights+masks slab
        slab_spec = pl.BlockSpec(slab.shape, lambda i: (0, 0),
                                 pipeline_mode=pl.Buffered(1))
    except (TypeError, AttributeError):
        slab_spec = pl.BlockSpec(slab.shape, lambda i: (0, 0))

    kernel = functools.partial(trans_encoder_kernel, n_layers, rows, layout)

    out = pl.pallas_call(
        kernel,
        out_shape=jax.ShapeDtypeStruct((B * S, D), x.dtype),
        grid_spec=pltpu.PrefetchScalarGridSpec(
            num_scalar_prefetch=0,
            grid=(num_steps,),
            in_specs=[x_spec, slab_spec],
            out_specs=out_spec,
        ),
        compiler_params=pltpu.CompilerParams(
            dimension_semantics=("parallel",),
        ),
    )(x2, slab)
    return out.reshape(B, S, D)


def ref_forward(x, params, n_layers):
    """Pure-JAX reference of the fused forward (pre-norm encoder layer x N)."""
    (g1, b1, wq, bq, wk, bk, wv, bv, wo, bo, g2, b2, w1, bf1, w2, bf2) = params
    B, S, D = x.shape
    scale = 1.0 / math.sqrt(D_HEAD)

    def ln(v, g, b):
        mu = jnp.mean(v, axis=-1, keepdims=True)
        var = jnp.mean((v - mu) ** 2, axis=-1, keepdims=True)
        return (v - mu) * jax.lax.rsqrt(var + LN_EPS) * g + b

    for _ in range(n_layers):
        xn = ln(x, g1, b1)
        q = (xn @ wq + bq).reshape(B, S, N_HEADS, D_HEAD).transpose(0, 2, 1, 3)
        k = (xn @ wk + bk).reshape(B, S, N_HEADS, D_HEAD).transpose(0, 2, 1, 3)
        v = (xn @ wv + bv).reshape(B, S, N_HEADS, D_HEAD).transpose(0, 2, 1, 3)
        s = jnp.einsum("bhqd,bhkd->bhqk", q, k) * scale
        p = jax.nn.softmax(s, axis=-1)
        o = jnp.einsum("bhqk,bhkd->bhqd", p, v).transpose(0, 2, 1, 3).reshape(B, S, D)
        x = x + o @ wo + bo
        xn2 = ln(x, g2, b2)
        x = x + jnp.maximum(xn2 @ w1 + bf1, 0.0) @ w2 + bf2
    return x


def init_params(key):
    """Deterministic parameter init (shapes implied by the encoder layer)."""
    ks = jax.random.split(key, 6)
    std = 0.02

    def lin(k, fan_in, fan_out):
        return std * jax.random.normal(k, (fan_in, fan_out), jnp.float32)

    g1 = jnp.ones((1, D_MODEL), jnp.float32)
    b1 = jnp.zeros((1, D_MODEL), jnp.float32)
    wq = lin(ks[0], D_MODEL, D_MODEL); bq = jnp.zeros((1, D_MODEL), jnp.float32)
    wk = lin(ks[1], D_MODEL, D_MODEL); bk = jnp.zeros((1, D_MODEL), jnp.float32)
    wv = lin(ks[2], D_MODEL, D_MODEL); bv = jnp.zeros((1, D_MODEL), jnp.float32)
    wo = lin(ks[3], D_MODEL, D_MODEL); bo = jnp.zeros((1, D_MODEL), jnp.float32)
    g2 = jnp.ones((1, D_MODEL), jnp.float32)
    b2 = jnp.zeros((1, D_MODEL), jnp.float32)
    w1 = lin(ks[4], D_MODEL, D_FF);   bf1 = jnp.zeros((1, D_FF), jnp.float32)
    w2 = lin(ks[5], D_FF, D_MODEL);   bf2 = jnp.zeros((1, D_MODEL), jnp.float32)

    return (g1, b1, wq, bq, wk, bk, wv, bv, wo, bo, g2, b2, w1, bf1, w2, bf2)


if __name__ == "__main__":
    key = jax.random.PRNGKey(0)
    k_x, k_p = jax.random.split(key)

    B, S = 2, 8
    N_LAYERS = 2
    x = jax.random.normal(k_x, (B, S, D_MODEL), jnp.float32)
    params = init_params(k_p)

    run = jax.jit(functools.partial(trans_encoder, n_layers=N_LAYERS))
    out = run(x, params)
    jax.block_until_ready(out)

    assert out.shape == (B, S, D_MODEL)
    assert bool(jnp.all(jnp.isfinite(out)))

    ref = ref_forward(x, params, N_LAYERS)
    err = float(jnp.max(jnp.abs(out - ref)))
    assert err < 1e-3, f"kernel/reference mismatch: {err}"

    print("KERNEL_OK")
</pallas_src>

<mosaic_0001>
module attributes {stable_mosaic.version = 11 : i64} {
  func.func @trans_encoder_kernel(%arg0: i32, %arg1: memref<8x32xf32, #tpu.memory_space<vmem>>, %arg2: memref<400x128xf32, #tpu.memory_space<vmem>>, %arg3: memref<8x32xf32, #tpu.memory_space<vmem>>) attributes {dimension_semantics = [#tpu.dimension_semantics<parallel>], iteration_bounds = array<i64: 2>, scalar_prefetch = 0 : i64, scratch_operands = 0 : i64, tpu.core_type = #tpu.core_type<tc>, window_params = [{transform_indices = @transform_0, window_bounds = array<i64: 8, 32>}, {pipeline_mode = #tpu.pipeline_mode<synchronous>, transform_indices = @transform_1, window_bounds = array<i64: 400, 128>}, {transform_indices = @transform_2, window_bounds = array<i64: 8, 32>}]} {
    %c0 = arith.constant 0 : index
    %c0_0 = arith.constant 0 : index
    %0 = vector.load %arg2[%c0, %c0_0] : memref<400x128xf32, #tpu.memory_space<vmem>>, vector<1x32xf32>
    %1 = vector.shape_cast %0 : vector<1x32xf32> to vector<1x32xf32>
    %2 = vector.broadcast %1 : vector<1x32xf32> to vector<8x32xf32>
    %c8 = arith.constant 8 : index
    %c0_1 = arith.constant 0 : index
    %3 = vector.load %arg2[%c8, %c0_1] : memref<400x128xf32, #tpu.memory_space<vmem>>, vector<1x32xf32>
    %4 = vector.shape_cast %3 : vector<1x32xf32> to vector<1x32xf32>
    %5 = vector.broadcast %4 : vector<1x32xf32> to vector<8x32xf32>
    %c16 = arith.constant 16 : index
    %c0_2 = arith.constant 0 : index
    %6 = vector.load %arg2[%c16, %c0_2] : memref<400x128xf32, #tpu.memory_space<vmem>>, vector<1x32xf32>
    %7 = vector.shape_cast %6 : vector<1x32xf32> to vector<1x32xf32>
    %8 = vector.broadcast %7 : vector<1x32xf32> to vector<8x32xf32>
    %c24 = arith.constant 24 : index
    %c0_3 = arith.constant 0 : index
    %9 = vector.load %arg2[%c24, %c0_3] : memref<400x128xf32, #tpu.memory_space<vmem>>, vector<1x32xf32>
    %10 = vector.shape_cast %9 : vector<1x32xf32> to vector<1x32xf32>
    %11 = vector.broadcast %10 : vector<1x32xf32> to vector<8x32xf32>
    %c32 = arith.constant 32 : index
    %c0_4 = arith.constant 0 : index
    %12 = vector.load %arg2[%c32, %c0_4] : memref<400x128xf32, #tpu.memory_space<vmem>>, vector<1x32xf32>
    %13 = vector.shape_cast %12 : vector<1x32xf32> to vector<1x32xf32>
    %14 = vector.broadcast %13 : vector<1x32xf32> to vector<8x32xf32>
    %c48 = arith.constant 48 : index
    %c0_5 = arith.constant 0 : index
    %15 = vector.load %arg2[%c48, %c0_5] : memref<400x128xf32, #tpu.memory_space<vmem>>, vector<1x64xf32>
    %16 = vector.shape_cast %15 : vector<1x64xf32> to vector<1x64xf32>
    %17 = vector.broadcast %16 : vector<1x64xf32> to vector<8x64xf32>
    %c40 = arith.constant 40 : index
    %c0_6 = arith.constant 0 : index
    %18 = vector.load %arg2[%c40, %c0_6] : memref<400x128xf32, #tpu.memory_space<vmem>>, vector<1x32xf32>
    %19 = vector.shape_cast %18 : vector<1x32xf32> to vector<1x32xf32>
    %20 = vector.broadcast %19 : vector<1x32xf32> to vector<8x32xf32>
    %c56 = arith.constant 56 : index
    %c0_7 = arith.constant 0 : index
    %21 = vector.load %arg2[%c56, %c0_7] : memref<400x128xf32, #tpu.memory_space<vmem>>, vector<32x32xf32>
    %c88 = arith.constant 88 : index
    %c0_8 = arith.constant 0 : index
    %22 = vector.load %arg2[%c88, %c0_8] : memref<400x128xf32, #tpu.memory_space<vmem>>, vector<32x64xf32>
    %c120 = arith.constant 120 : index
    %c0_9 = arith.constant 0 : index
    %23 = vector.load %arg2[%c120, %c0_9] : memref<400x128xf32, #tpu.memory_space<vmem>>, vector<64x32xf32>
    %c184 = arith.constant 184 : index
    %c0_10 = arith.constant 0 : index
    %24 = vector.load %arg2[%c184, %c0_10] : memref<400x128xf32, #tpu.memory_space<vmem>>, vector<8x128xf32>
    %25 = tpu.transpose %24, [1, 0] : vector<8x128xf32> -> vector<128x8xf32>
    %c192 = arith.constant 192 : index
    %c0_11 = arith.constant 0 : index
    %26 = vector.load %arg2[%c192, %c0_11] : memref<400x128xf32, #tpu.memory_space<vmem>>, vector<8x128xf32>
    %27 = tpu.transpose %26, [1, 0] : vector<8x128xf32> -> vector<128x8xf32>
    %c200 = arith.constant 200 : index
    %c0_12 = arith.constant 0 : index
    %28 = vector.load %arg2[%c200, %c0_12] : memref<400x128xf32, #tpu.memory_space<vmem>>, vector<8x128xf32>
    %29 = tpu.transpose %28, [1, 0] : vector<8x128xf32> -> vector<128x8xf32>
    %c208 = arith.constant 208 : index
    %c0_13 = arith.constant 0 : index
    %30 = vector.load %arg2[%c208, %c0_13] : memref<400x128xf32, #tpu.memory_space<vmem>>, vector<32x8xf32>
    %c240 = arith.constant 240 : index
    %c0_14 = arith.constant 0 : index
    %31 = vector.load %arg2[%c240, %c0_14] : memref<400x128xf32, #tpu.memory_space<vmem>>, vector<32x8xf32>
    %c272 = arith.constant 272 : index
    %c0_15 = arith.constant 0 : index
    %32 = vector.load %arg2[%c272, %c0_15] : memref<400x128xf32, #tpu.memory_space<vmem>>, vector<32x8xf32>
    %c304 = arith.constant 304 : index
    %c0_16 = arith.constant 0 : index
    %33 = vector.load %arg2[%c304, %c0_16] : memref<400x128xf32, #tpu.memory_space<vmem>>, vector<32x128xf32>
    %c336 = arith.constant 336 : index
    %c0_17 = arith.constant 0 : index
    %34 = vector.load %arg2[%c336, %c0_17] : memref<400x128xf32, #tpu.memory_space<vmem>>, vector<32x32xf32>
    %c368 = arith.constant 368 : index
    %c0_18 = arith.constant 0 : index
    %35 = vector.load %arg2[%c368, %c0_18] : memref<400x128xf32, #tpu.memory_space<vmem>>, vector<32x32xf32>
    %c0_19 = arith.constant 0 : index
    %c0_20 = arith.constant 0 : index
    %36 = vector.load %arg1[%c0_19, %c0_20] : memref<8x32xf32, #tpu.memory_space<vmem>>, vector<8x32xf32>
    %cst = arith.constant dense<0.000000e+00> : vector<8xf32>
    %37 = vector.multi_reduction <add>, %36, %cst [1] : vector<8x32xf32> to vector<8xf32>
    %38 = vector.shape_cast %37 : vector<8xf32> to vector<8x1xf32>
    %cst_21 = arith.constant 3.200000e+01 : f32
    %39 = vector.broadcast %cst_21 : f32 to vector<8x1xf32>
    %40 = arith.divf %38, %39 : vector<8x1xf32>
    %41 = vector.broadcast %40 : vector<8x1xf32> to vector<8x32xf32>
    %42 = arith.subf %36, %41 : vector<8x32xf32>
    %43 = arith.mulf %42, %42 : vector<8x32xf32>
    %cst_22 = arith.constant dense<0.000000e+00> : vector<8xf32>
    %44 = vector.multi_reduction <add>, %43, %cst_22 [1] : vector<8x32xf32> to vector<8xf32>
    %45 = vector.shape_cast %44 : vector<8xf32> to vector<8x1xf32>
    %cst_23 = arith.constant 3.200000e+01 : f32
    %46 = vector.broadcast %cst_23 : f32 to vector<8x1xf32>
    %47 = arith.divf %45, %46 : vector<8x1xf32>
    %48 = vector.broadcast %40 : vector<8x1xf32> to vector<8x32xf32>
    %49 = arith.subf %36, %48 : vector<8x32xf32>
    %cst_24 = arith.constant 9.99999974E-6 : f32
    %50 = vector.broadcast %cst_24 : f32 to vector<8x1xf32>
    %51 = arith.addf %47, %50 : vector<8x1xf32>
    %52 = math.rsqrt %51 : vector<8x1xf32>
    %53 = vector.broadcast %52 : vector<8x1xf32> to vector<8x32xf32>
    %54 = arith.mulf %49, %53 : vector<8x32xf32>
    %55 = arith.mulf %54, %2 : vector<8x32xf32>
    %56 = arith.addf %55, %5 : vector<8x32xf32>
    %57 = tpu.concatenate %56, %56, %56, %56 in 1 : vector<8x32xf32>, vector<8x32xf32>, vector<8x32xf32>, vector<8x32xf32> -> vector<8x128xf32>
    %58 = tpu.concatenate %57, %57, %57, %57 in 0 : vector<8x128xf32>, vector<8x128xf32>, vector<8x128xf32>, vector<8x128xf32> -> vector<32x128xf32>
    %59 = arith.mulf %58, %33 : vector<32x128xf32>
    %cst_25 = arith.constant dense<0.000000e+00> : vector<32x8xf32>
    %60 = tpu.matmul %59, %25, %cst_25 {dimension_numbers = #tpu.dot_dimension_numbers<[1], [0], [0], [1], [0, 0, 1, 1], [], []>} : vector<32x128xf32>, vector<128x8xf32>, vector<32x8xf32> -> vector<32x8xf32>
    %61 = arith.addf %60, %30 : vector<32x8xf32>
    %cst_26 = arith.constant dense<0.000000e+00> : vector<32x8xf32>
    %62 = tpu.matmul %59, %27, %cst_26 {dimension_numbers = #tpu.dot_dimension_numbers<[1], [0], [0], [1], [0, 0, 1, 1], [], []>} : vector<32x128xf32>, vector<128x8xf32>, vector<32x8xf32> -> vector<32x8xf32>
    %63 = arith.addf %62, %31 : vector<32x8xf32>
    %cst_27 = arith.constant dense<0.000000e+00> : vector<32x8xf32>
    %64 = tpu.matmul %59, %29, %cst_27 {dimension_numbers = #tpu.dot_dimension_numbers<[1], [0], [0], [1], [0, 0, 1, 1], [], []>} : vector<32x128xf32>, vector<128x8xf32>, vector<32x8xf32> -> vector<32x8xf32>
    %65 = arith.addf %64, %32 : vector<32x8xf32>
    "tpu.trace_start"() <{level = 10 : i32, message = "rd,cd->rc"}> : () -> ()
    %cst_28 = arith.constant dense<0.000000e+00> : vector<32x32xf32>
    %66 = tpu.matmul %61, %63, %cst_28 {dimension_numbers = #tpu.dot_dimension_numbers<[1], [1], [0], [0], [0, 0, 1, 0], [], []>} : vector<32x8xf32>, vector<32x8xf32>, vector<32x32xf32> -> vector<32x32xf32>
    "tpu.trace_stop"() : () -> ()
    %67 = arith.addf %66, %34 : vector<32x32xf32>
    %cst_29 = arith.constant dense<0xFF800000> : vector<32xf32>
    %68 = vector.multi_reduction <maximumf>, %67, %cst_29 [1] : vector<32x32xf32> to vector<32xf32>
    %69 = vector.shape_cast %68 : vector<32xf32> to vector<32x1xf32>
    %70 = vector.broadcast %69 : vector<32x1xf32> to vector<32x32xf32>
    %71 = arith.subf %67, %70 : vector<32x32xf32>
    %72 = math.exp %71 : vector<32x32xf32>
    %cst_30 = arith.constant dense<0.000000e+00> : vector<32xf32>
    %73 = vector.multi_reduction <add>, %72, %cst_30 [1] : vector<32x32xf32> to vector<32xf32>
    %74 = vector.shape_cast %73 : vector<32xf32> to vector<32x1xf32>
    %75 = vector.broadcast %74 : vector<32x1xf32> to vector<32x32xf32>
    %76 = arith.divf %72, %75 : vector<32x32xf32>
    %cst_31 = arith.constant dense<0.000000e+00> : vector<32x8xf32>
    %77 = tpu.matmul %76, %65, %cst_31 {dimension_numbers = #tpu.dot_dimension_numbers<[1], [0], [0], [1], [0, 0, 1, 1], [], []>} : vector<32x32xf32>, vector<32x8xf32>, vector<32x8xf32> -> vector<32x8xf32>
    %78 = tpu.concatenate %77, %77, %77, %77 in 1 : vector<32x8xf32>, vector<32x8xf32>, vector<32x8xf32>, vector<32x8xf32> -> vector<32x32xf32>
    %79 = arith.mulf %78, %35 : vector<32x32xf32>
    %cst_32 = arith.constant dense<0.000000e+00> : vector<32x32xf32>
    %80 = tpu.matmul %79, %21, %cst_32 {dimension_numbers = #tpu.dot_dimension_numbers<[1], [0], [0], [1], [0, 0, 1, 1], [], []>} : vector<32x32xf32>, vector<32x32xf32>, vector<32x32xf32> -> vector<32x32xf32>
    %81 = vector.extract_strided_slice %80 {offsets = [0, 0], sizes = [8, 32], strides = [1, 1]} : vector<32x32xf32> to vector<8x32xf32>
    %82 = vector.extract_strided_slice %80 {offsets = [8, 0], sizes = [8, 32], strides = [1, 1]} : vector<32x32xf32> to vector<8x32xf32>
    %83 = arith.addf %81, %82 : vector<8x32xf32>
    %84 = vector.extract_strided_slice %80 {offsets = [16, 0], sizes = [8, 32], strides = [1, 1]} : vector<32x32xf32> to vector<8x32xf32>
    %85 = arith.addf %83, %84 : vector<8x32xf32>
    %86 = vector.extract_strided_slice %80 {offsets = [24, 0], sizes = [8, 32], strides = [1, 1]} : vector<32x32xf32> to vector<8x32xf32>
    %87 = arith.addf %85, %86 : vector<8x32xf32>
    %88 = arith.addf %36, %87 : vector<8x32xf32>
    %89 = arith.addf %88, %14 : vector<8x32xf32>
    %cst_33 = arith.constant dense<0.000000e+00> : vector<8xf32>
    %90 = vector.multi_reduction <add>, %89, %cst_33 [1] : vector<8x32xf32> to vector<8xf32>
    %91 = vector.shape_cast %90 : vector<8xf32> to vector<8x1xf32>
    %cst_34 = arith.constant 3.200000e+01 : f32
    %92 = vector.broadcast %cst_34 : f32 to vector<8x1xf32>
    %93 = arith.divf %91, %92 : vector<8x1xf32>
    %94 = vector.broadcast %93 : vector<8x1xf32> to vector<8x32xf32>
    %95 = arith.subf %89, %94 : vector<8x32xf32>
    %96 = arith.mulf %95, %95 : vector<8x32xf32>
    %cst_35 = arith.constant dense<0.000000e+00> : vector<8xf32>
    %97 = vector.multi_reduction <add>, %96, %cst_35 [1] : vector<8x32xf32> to vector<8xf32>
    %98 = vector.shape_cast %97 : vector<8xf32> to vector<8x1xf32>
    %cst_36 = arith.constant 3.200000e+01 : f32
    %99 = vector.broadcast %cst_36 : f32 to vector<8x1xf32>
    %100 = arith.divf %98, %99 : vector<8x1xf32>
    %101 = vector.broadcast %93 : vector<8x1xf32> to vector<8x32xf32>
    %102 = arith.subf %89, %101 : vector<8x32xf32>
    %cst_37 = arith.constant 9.99999974E-6 : f32
    %103 = vector.broadcast %cst_37 : f32 to vector<8x1xf32>
    %104 = arith.addf %100, %103 : vector<8x1xf32>
    %105 = math.rsqrt %104 : vector<8x1xf32>
    %106 = vector.broadcast %105 : vector<8x1xf32> to vector<8x32xf32>
    %107 = arith.mulf %102, %106 : vector<8x32xf32>
    %108 = arith.mulf %107, %8 : vector<8x32xf32>
    %109 = arith.addf %108, %11 : vector<8x32xf32>
    %cst_38 = arith.constant dense<0.000000e+00> : vector<8x64xf32>
    %110 = tpu.matmul %109, %22, %cst_38 {dimension_numbers = #tpu.dot_dimension_numbers<[1], [0], [0], [1], [0, 0, 1, 1], [], []>} : vector<8x32xf32>, vector<32x64xf32>, vector<8x64xf32> -> vector<8x64xf32>
    %111 = arith.addf %110, %17 : vector<8x64xf32>
    %cst_39 = arith.constant 0.000000e+00 : f32
    %112 = vector.broadcast %cst_39 : f32 to vector<8x64xf32>
    %113 = arith.maximumf %111, %112 : vector<8x64xf32>
    %cst_40 = arith.constant dense<0.000000e+00> : vector<8x32xf32>
    %114 = tpu.matmul %113, %23, %cst_40 {dimension_numbers = #tpu.dot_dimension_numbers<[1], [0], [0], [1], [0, 0, 1, 1], [], []>} : vector<8x64xf32>, vector<64x32xf32>, vector<8x32xf32> -> vector<8x32xf32>
    %115 = arith.addf %89, %114 : vector<8x32xf32>
    %116 = arith.addf %115, %20 : vector<8x32xf32>
    %cst_41 = arith.constant dense<0.000000e+00> : vector<8xf32>
    %117 = vector.multi_reduction <add>, %116, %cst_41 [1] : vector<8x32xf32> to vector<8xf32>
    %118 = vector.shape_cast %117 : vector<8xf32> to vector<8x1xf32>
    %cst_42 = arith.constant 3.200000e+01 : f32
    %119 = vector.broadcast %cst_42 : f32 to vector<8x1xf32>
    %120 = arith.divf %118, %119 : vector<8x1xf32>
    %121 = vector.broadcast %120 : vector<8x1xf32> to vector<8x32xf32>
    %122 = arith.subf %116, %121 : vector<8x32xf32>
    %123 = arith.mulf %122, %122 : vector<8x32xf32>
    %cst_43 = arith.constant dense<0.000000e+00> : vector<8xf32>
    %124 = vector.multi_reduction <add>, %123, %cst_43 [1] : vector<8x32xf32> to vector<8xf32>
    %125 = vector.shape_cast %124 : vector<8xf32> to vector<8x1xf32>
    %cst_44 = arith.constant 3.200000e+01 : f32
    %126 = vector.broadcast %cst_44 : f32 to vector<8x1xf32>
    %127 = arith.divf %125, %126 : vector<8x1xf32>
    %128 = vector.broadcast %120 : vector<8x1xf32> to vector<8x32xf32>
    %129 = arith.subf %116, %128 : vector<8x32xf32>
    %cst_45 = arith.constant 9.99999974E-6 : f32
    %130 = vector.broadcast %cst_45 : f32 to vector<8x1xf32>
    %131 = arith.addf %127, %130 : vector<8x1xf32>
    %132 = math.rsqrt %131 : vector<8x1xf32>
    %133 = vector.broadcast %132 : vector<8x1xf32> to vector<8x32xf32>
    %134 = arith.mulf %129, %133 : vector<8x32xf32>
    %135 = arith.mulf %134, %2 : vector<8x32xf32>
    %136 = arith.addf %135, %5 : vector<8x32xf32>
    %137 = tpu.concatenate %136, %136, %136, %136 in 1 : vector<8x32xf32>, vector<8x32xf32>, vector<8x32xf32>, vector<8x32xf32> -> vector<8x128xf32>
    %138 = tpu.concatenate %137, %137, %137, %137 in 0 : vector<8x128xf32>, vector<8x128xf32>, vector<8x128xf32>, vector<8x128xf32> -> vector<32x128xf32>
    %139 = arith.mulf %138, %33 : vector<32x128xf32>
    %cst_46 = arith.constant dense<0.000000e+00> : vector<32x8xf32>
    %140 = tpu.matmul %139, %25, %cst_46 {dimension_numbers = #tpu.dot_dimension_numbers<[1], [0], [0], [1], [0, 0, 1, 1], [], []>} : vector<32x128xf32>, vector<128x8xf32>, vector<32x8xf32> -> vector<32x8xf32>
    %141 = arith.addf %140, %30 : vector<32x8xf32>
    %cst_47 = arith.constant dense<0.000000e+00> : vector<32x8xf32>
    %142 = tpu.matmul %139, %27, %cst_47 {dimension_numbers = #tpu.dot_dimension_numbers<[1], [0], [0], [1], [0, 0, 1, 1], [], []>} : vector<32x128xf32>, vector<128x8xf32>, vector<32x8xf32> -> vector<32x8xf32>
    %143 = arith.addf %142, %31 : vector<32x8xf32>
    %cst_48 = arith.constant dense<0.000000e+00> : vector<32x8xf32>
    %144 = tpu.matmul %139, %29, %cst_48 {dimension_numbers = #tpu.dot_dimension_numbers<[1], [0], [0], [1], [0, 0, 1, 1], [], []>} : vector<32x128xf32>, vector<128x8xf32>, vector<32x8xf32> -> vector<32x8xf32>
    %145 = arith.addf %144, %32 : vector<32x8xf32>
    "tpu.trace_start"() <{level = 10 : i32, message = "rd,cd->rc"}> : () -> ()
    %cst_49 = arith.constant dense<0.000000e+00> : vector<32x32xf32>
    %146 = tpu.matmul %141, %143, %cst_49 {dimension_numbers = #tpu.dot_dimension_numbers<[1], [1], [0], [0], [0, 0, 1, 0], [], []>} : vector<32x8xf32>, vector<32x8xf32>, vector<32x32xf32> -> vector<32x32xf32>
    "tpu.trace_stop"() : () -> ()
    %147 = arith.addf %146, %34 : vector<32x32xf32>
    %cst_50 = arith.constant dense<0xFF800000> : vector<32xf32>
    %148 = vector.multi_reduction <maximumf>, %147, %cst_50 [1] : vector<32x32xf32> to vector<32xf32>
    %149 = vector.shape_cast %148 : vector<32xf32> to vector<32x1xf32>
    %150 = vector.broadcast %149 : vector<32x1xf32> to vector<32x32xf32>
    %151 = arith.subf %147, %150 : vector<32x32xf32>
    %152 = math.exp %151 : vector<32x32xf32>
    %cst_51 = arith.constant dense<0.000000e+00> : vector<32xf32>
    %153 = vector.multi_reduction <add>, %152, %cst_51 [1] : vector<32x32xf32> to vector<32xf32>
    %154 = vector.shape_cast %153 : vector<32xf32> to vector<32x1xf32>
    %155 = vector.broadcast %154 : vector<32x1xf32> to vector<32x32xf32>
    %156 = arith.divf %152, %155 : vector<32x32xf32>
    %cst_52 = arith.constant dense<0.000000e+00> : vector<32x8xf32>
    %157 = tpu.matmul %156, %145, %cst_52 {dimension_numbers = #tpu.dot_dimension_numbers<[1], [0], [0], [1], [0, 0, 1, 1], [], []>} : vector<32x32xf32>, vector<32x8xf32>, vector<32x8xf32> -> vector<32x8xf32>
    %158 = tpu.concatenate %157, %157, %157, %157 in 1 : vector<32x8xf32>, vector<32x8xf32>, vector<32x8xf32>, vector<32x8xf32> -> vector<32x32xf32>
    %159 = arith.mulf %158, %35 : vector<32x32xf32>
    %cst_53 = arith.constant dense<0.000000e+00> : vector<32x32xf32>
    %160 = tpu.matmul %159, %21, %cst_53 {dimension_numbers = #tpu.dot_dimension_numbers<[1], [0], [0], [1], [0, 0, 1, 1], [], []>} : vector<32x32xf32>, vector<32x32xf32>, vector<32x32xf32> -> vector<32x32xf32>
    %161 = vector.extract_strided_slice %160 {offsets = [0, 0], sizes = [8, 32], strides = [1, 1]} : vector<32x32xf32> to vector<8x32xf32>
    %162 = vector.extract_strided_slice %160 {offsets = [8, 0], sizes = [8, 32], strides = [1, 1]} : vector<32x32xf32> to vector<8x32xf32>
    %163 = arith.addf %161, %162 : vector<8x32xf32>
    %164 = vector.extract_strided_slice %160 {offsets = [16, 0], sizes = [8, 32], strides = [1, 1]} : vector<32x32xf32> to vector<8x32xf32>
    %165 = arith.addf %163, %164 : vector<8x32xf32>
    %166 = vector.extract_strided_slice %160 {offsets = [24, 0], sizes = [8, 32], strides = [1, 1]} : vector<32x32xf32> to vector<8x32xf32>
    %167 = arith.addf %165, %166 : vector<8x32xf32>
    %168 = arith.addf %116, %167 : vector<8x32xf32>
    %169 = arith.addf %168, %14 : vector<8x32xf32>
    %cst_54 = arith.constant dense<0.000000e+00> : vector<8xf32>
    %170 = vector.multi_reduction <add>, %169, %cst_54 [1] : vector<8x32xf32> to vector<8xf32>
    %171 = vector.shape_cast %170 : vector<8xf32> to vector<8x1xf32>
    %cst_55 = arith.constant 3.200000e+01 : f32
    %172 = vector.broadcast %cst_55 : f32 to vector<8x1xf32>
    %173 = arith.divf %171, %172 : vector<8x1xf32>
    %174 = vector.broadcast %173 : vector<8x1xf32> to vector<8x32xf32>
    %175 = arith.subf %169, %174 : vector<8x32xf32>
    %176 = arith.mulf %175, %175 : vector<8x32xf32>
    %cst_56 = arith.constant dense<0.000000e+00> : vector<8xf32>
    %177 = vector.multi_reduction <add>, %176, %cst_56 [1] : vector<8x32xf32> to vector<8xf32>
    %178 = vector.shape_cast %177 : vector<8xf32> to vector<8x1xf32>
    %cst_57 = arith.constant 3.200000e+01 : f32
    %179 = vector.broadcast %cst_57 : f32 to vector<8x1xf32>
    %180 = arith.divf %178, %179 : vector<8x1xf32>
    %181 = vector.broadcast %173 : vector<8x1xf32> to vector<8x32xf32>
    %182 = arith.subf %169, %181 : vector<8x32xf32>
    %cst_58 = arith.constant 9.99999974E-6 : f32
    %183 = vector.broadcast %cst_58 : f32 to vector<8x1xf32>
    %184 = arith.addf %180, %183 : vector<8x1xf32>
    %185 = math.rsqrt %184 : vector<8x1xf32>
    %186 = vector.broadcast %185 : vector<8x1xf32> to vector<8x32xf32>
    %187 = arith.mulf %182, %186 : vector<8x32xf32>
    %188 = arith.mulf %187, %8 : vector<8x32xf32>
    %189 = arith.addf %188, %11 : vector<8x32xf32>
    %cst_59 = arith.constant dense<0.000000e+00> : vector<8x64xf32>
    %190 = tpu.matmul %189, %22, %cst_59 {dimension_numbers = #tpu.dot_dimension_numbers<[1], [0], [0], [1], [0, 0, 1, 1], [], []>} : vector<8x32xf32>, vector<32x64xf32>, vector<8x64xf32> -> vector<8x64xf32>
    %191 = arith.addf %190, %17 : vector<8x64xf32>
    %cst_60 = arith.constant 0.000000e+00 : f32
    %192 = vector.broadcast %cst_60 : f32 to vector<8x64xf32>
    %193 = arith.maximumf %191, %192 : vector<8x64xf32>
    %cst_61 = arith.constant dense<0.000000e+00> : vector<8x32xf32>
    %194 = tpu.matmul %193, %23, %cst_61 {dimension_numbers = #tpu.dot_dimension_numbers<[1], [0], [0], [1], [0, 0, 1, 1], [], []>} : vector<8x64xf32>, vector<64x32xf32>, vector<8x32xf32> -> vector<8x32xf32>
    %195 = arith.addf %169, %194 : vector<8x32xf32>
    %196 = arith.addf %195, %20 : vector<8x32xf32>
    %c0_62 = arith.constant 0 : index
    %c0_63 = arith.constant 0 : index
    %197 = vector.load %arg3[%c0_62, %c0_63] : memref<8x32xf32, #tpu.memory_space<vmem>>, vector<8x32xf32>
    tpu.vector_store %arg3[%c0_62, %c0_63], %196 {strides = array<i32>} : memref<8x32xf32, #tpu.memory_space<vmem>>, vector<8x32xf32>,
    return
  }
  func.func @transform_0(%arg0: i32) -> (i32, i32) {
    %c0_i32 = arith.constant 0 : i32
    %c0_i32_0 = arith.constant 0 : i32
    return %arg0, %c0_i32 : i32, i32
  }
  func.func @transform_1(%arg0: i32) -> (i32, i32) {
    %c0_i32 = arith.constant 0 : i32
    %c0_i32_0 = arith.constant 0 : i32
    %c0_i32_1 = arith.constant 0 : i32
    return %c0_i32, %c0_i32_0 : i32, i32
  }
  func.func @transform_2(%arg0: i32) -> (i32, i32) {
    %c0_i32 = arith.constant 0 : i32
    %c0_i32_0 = arith.constant 0 : i32
    return %arg0, %c0_i32 : i32, i32
  }
}

</mosaic_0001>

<bundles_post_ra>
// kernel: trans_encoder.1
= control target key start
LH: loop header
LB: loop body
LE: loop exit
PB: predicated region body
PF: predicated region fallthrough
CT: control target
= control target key end

     0   :  { %7 = vsyncpa [#allocation3], 0  ;;  %s3235_s0 = inlined_call_operand.vmem [shape: f32[16,32], index: 0, kind: input, shape index: {}]   ;;  %s3236_s1 = inlined_call_operand.vmem [shape: f32[400,128], index: 1, kind: input, shape index: {}]   ;;  %s3237_s2 = inlined_call_operand.hbm [shape: f32[16,32], index: 2, kind: output, shape index: {}]  }
   0x1   :  { %9 = vsyncpa [#allocation3 + $0x1], 0  ;;  %s2637_s9 = smov 0   ;;  %s2639_s10 = smov 0  }
   0x2   :  { %s2641_s11 = smov 0   ;;  %s2643_s12 = smov 0  }
   0x3 LB: > { %s2658_s13 = sadd.s32 4294967295, %s2610_s12   ;;  %s2017_s14 = sadd.s32 4294967294, %s2610_s12   ;;  %s2610_s12 = sphi %s2643_s12, %s3245_s12   ;;  %s2606_s11 = sphi %s2641_s11, %s3244_s11   ;;  %s2602_s10 = sphi %s2639_s10, %s3243_s10   ;;  %s2598_s9 = sphi %s2637_s9, %s3242_s9  }
   0x4   : > { %s2662_s15 = sadd.s32 1, %s2610_s12   ;;  %s69_s16 = sadd.s32 1, %s2606_s11 }
   0x5   : > { %s66_s17 = ssub.s32 %s2610_s12, %s2662_s15  ;;  %p79_p0 = scmp.ne.s32.totalorder %s2606_s11, %s2602_s10 }
   0x6   : > { %p67_p1 = scmp.eq.s32.totalorder %s66_s17, 0  ;;  %p80_p2 = scmp.eq.s32.totalorder %s2658_s13, 1 }
   0x7   : > { %p85_p3 = scmp.ne.s32.totalorder %s2602_s10, %s2598_s9  ;;  %p86_p4 = scmp.eq.s32.totalorder %s2017_s14, 1 }
   0x8   : > { %s2673_s18 = scalar_select %p67_p1, %s2606_s11, %s69_s16  }
   0x9   : > { %p2675_p5 = por %p80_p2, %p79_p0  ;;  %p2679_p6 = por %p86_p4, %p85_p3 }
   0xa   : > { %p2020_p7 = scmp.ge.s32.totalorder %s2610_s12, 1  ;;  %p114_p8 = scmp.lt.s32.totalorder %s2610_s12, 3 }
   0xc   : > { %p115_p9 = pnand %p2020_p7, %p114_p8 }
   0xd   : > { %p135_p10 = scmp.lt.s32.totalorder (!%p115_p9), %s2658_s13, 1  ;;  %vm218_vm0 = vcmask (!%p115_p9), 261120   ;;  %v2699_v10 = vld [vmem:[%s3236_s1 + $0xb8] sm:$0xff] (!%p115_p9)  ;;  %v2704_v11 = vld [vmem:[%s3236_s1 + $0xc8] sm:$0xff] (!%p115_p9)  ;;  %v2711_v13 = vld [vmem:[%s3236_s1] ss:$0 sm:$0xff] (!%p115_p9) }
   0xe   : > { %118 = sbr.rel (%p115_p9) target bundleno = 5095 (0x13e7), region = 28  ;;  %2176 = vmatprep.subr.mxu1 (!%p115_p9), %v2699_v10  ;;  %2192 = vmatprep.subr.mxu0 (!%p115_p9), %v2704_v11  ;;  %v2718_v15 = vld [vmem:[%s3236_s1 + $0x8] ss:$0 sm:$0xff] (!%p115_p9)  ;;  %v2723_v16 = vld [vmem:[%s3236_s1 + $0xc0] sm:$0xff] (!%p115_p9)  ;;  %s2612_s8 = smov (!%p115_p9), 96   ;;  %vm246_vm1 = vcmask (!%p115_p9), 523264  }
   0xf   : > { %2177 = vmatpush3.xpose.msra.mxu1 (!%p115_p9), %v2699_v10  ;;  %2193 = vmatpush3.xpose.msra.mxu0 (!%p115_p9), %v2704_v11  ;;  %s2613_s14 = smov (!%p115_p9), 32   ;;  %s2614_s16 = smov (!%p115_p9), 64   ;;  %vm248_vm2 = vcmask (!%p115_p9), 785408   ;;  %v2735_v22 = vld [vmem:[%s3236_s1 + $0x130] sm:$0xff] (!%p115_p9)  ;;  %v2740_v23 = vld [vmem:[%s3236_s1 + $0x138] sm:$0xff] (!%p115_p9)  ;;  %v2747_v27 = vld [vmem:[%s3236_s1 + $0x140] sm:$0xff] (!%p115_p9) }
  0x10   : > { %2184 = vmatprep.subr.mxu1 (!%p115_p9), %v2723_v16  ;;  %v2755_v31 = vld [vmem:[%s3236_s1 + $0x148] sm:$0xff] (!%p115_p9)  ;;  %v2762_v33 = vld [vmem:[%s3236_s1 + $0x118] sm:$0xff] (!%p115_p9)  ;;  %v2767_v34 = vld [vmem:[%s3236_s1 + $0xd0] sm:$0xff] (!%p115_p9)  ;;  %vm509_vm3 = vcmask (!%p115_p9), 64512   ;;  %s2615_s17 = smov (!%p115_p9), 16   ;;  %vm804_vm5 = vcmask (!%p115_p9), 130048  }
  0x11   : > { %v2772_v35 = vld [vmem:[%s3236_s1 + $0x110] sm:$0xff] (!%p115_p9)  ;;  %v2780_v43 = vld [vmem:[%s3236_s1 + $0x128] sm:$0xff] (!%p115_p9)  ;;  %v2785_v44 = vld [vmem:[%s3236_s1 + $0x120] sm:$0xff] (!%p115_p9)  ;;  %vm809_vm6 = vcmask (!%p115_p9), 195584   ;;  %vm2619_vm7 = vmmov (!%p115_p9), 0   ;;  %s2621_s29 = smov (!%p115_p9), [#allocation2]  }
  0x12   : > { %v2793_v52 = vld [vmem:[%s3236_s1 + $0xf8] sm:$0xff] (!%p115_p9)  ;;  %v2798_v53 = vld [vmem:[%s3236_s1 + $0xf0] sm:$0xff] (!%p115_p9)  ;;  %v2805_v59 = vld [vmem:[%s3236_s1 + $0x108] sm:$0xff] (!%p115_p9)  ;;  %s2552_s30 = sshll.u32 (!%p115_p9), %s2621_s29, 4  ;;  %s2553_s30 = int_to_ptr.vmem [resolvable:$false] %s2552_s30 }
  0x13   : > { %v2810_v60 = vld [vmem:[%s3236_s1 + $0x100] sm:$0xff] (!%p115_p9)  ;;  %vm2814_vm4 = vmpackc.low (!%p115_p9), %vm509_vm3, %vm509_vm3  ;;  %s2554_s3 = scalar_lea.vmem (!%p115_p9), %s2553_s30, 256 }
  0x15   : > { %s136_s21 = scalar_select %p135_p10, %s2658_s13, 1 }
  0x17   : > { %s2022_s22 = sshll.u32 %s136_s21, 3  ;;  %s2616_s21 = smov 8  }
  0x18   : > { %s138_s25 = scalar_lea.vmem %s3235_s0, %s2022_s22  ;;  %s2617_s22 = smov 24  }
  0x19   : > { %v2690_v0 = vld [vmem:[%s138_s25] sm:$0xff] }
  0x1a   : > { %v219_v1 = vsel %vm218_vm0, %v2690_v0, 0.0 }
  0x1b   : > { %220 = vadd.xlane.f32.xlu0 %v219_v1 }
  0xa8   : > { %v221_v2 = vpop.xlane.xlu0 %220 }
  0xa9   : > { %v223_v3 = vmul.f32 0.03125, %v221_v2 }
  0xab   : > { %v224_v4 = vsub.f32 %v2690_v0, %v223_v3 }
  0xad   : > { %v225_v5 = vmul.f32 %v224_v4, %v224_v4 }
  0xaf   : > { %v226_v6 = vsel %vm218_vm0, %v225_v5, 0.0  ;;  %v2831_v5 = vld [vmem:[%s3236_s1 + $0xd8] sm:$0xff] }
  0xb0   : > { %227 = vadd.xlane.f32.xlu0 %v226_v6  ;;  %v2836_v6 = vld [vmem:[%s3236_s1 + $0xe0] sm:$0xff] }
 0x13d   : > { %v228_v7 = vpop.xlane.xlu0 %227 }
 0x13e   : > { %v229_v8 = vmul.f32 0.03125, %v228_v7 }
 0x140   : > { %v230_v9 = vadd.f32 1e-05, %v229_v8  ;;  %v2842_v8 = vld [vmem:[%s3236_s1 + $0xe8] sm:$0xff] }
 0x142   : > { %2508 = vrsqrt.f32 %v230_v9 }
 0x14c   : > { %v2509_v12 = vpop.eup %2508 }
 0x14d   : > { %v232_v14 = vmul.f32 %v2509_v12, %v224_v4 }
 0x14f   : > { %v233_v17 = vmul.f32 %v2711_v13, %v232_v14  ;;  %v2852_v14 = vld [vmem:[%s3236_s1 + $0x158] sm:$0xff] }
 0x151   : > { %v234_v18 = vadd.f32 %v2718_v15, %v233_v17  ;;  %v2857_v17 = vld [vmem:[%s3236_s1 + $0x150] sm:$0xff] }
 0x153   : > { %242 = vrot.lane.b32.xlu0 %v234_v18, %s2612_s8  ;;  %236 = vrot.lane.b32.xlu1 %v234_v18, %s2613_s14 }
 0x157   : > { %239 = vrot.lane.b32.xlu1 %v234_v18, %s2614_s16 }
 0x1c5   : > { %v237_v19 = vpop.permute.xlu1 %236  ;;  %v243_v24 = vpop.permute.xlu0 %242 }
 0x1c6   : > { %v245_v20 = vsel %vm218_vm0, %v234_v18, %v237_v19 }
 0x1c9   : > { %v240_v21 = vpop.permute.xlu1 %239 }
 0x1ca   : > { %v247_v25 = vsel %vm246_vm1, %v245_v20, %v240_v21 }
 0x1cb   : > { %v249_v26 = vsel %vm248_vm2, %v247_v25, %v243_v24  ;;  %v2865_v25 = vld [vmem:[%s3236_s1 + $0x160] sm:$0xff] }
 0x1cc   : > { %v250_v28 = vmul.f32 %v249_v26, %v2735_v22  ;;  %v251_v29 = vmul.f32 %v249_v26, %v2740_v23  ;;  %v252_v30 = vmul.f32 %v249_v26, %v2747_v27  ;;  %v253_v32 = vmul.f32 %v249_v26, %v2755_v31 }
 0x1ce   : > { %2178 = vmatprep.mubr.f32.mxu1 %v250_v28  ;;  %2194 = vmatprep.mubr.f32.mxu0 %v250_v28 }
 0x1cf   : > { %2179 = vmatmul.mubr.f32.vlgmr.msra.gmra.mrb[0].mxu1 %v251_v29  ;;  %2195 = vmatmul.mubr.f32.vlgmr.msra.gmra.mrb[0].mxu0 %v251_v29 }
 0x1d0   : > { %2185 = vmatpush3.xpose.msra.mxu1 %v2723_v16  ;;  %2181 = vmatprep.mubr.f32.mxu1 %v252_v30 }
 0x1d1   : > { %2197 = vmatprep.mubr.f32.mxu0 %v252_v30 }
 0x1d3   : > { %2182 = vmatmul.mubr.f32.gmra.mrb[2].mxu1 %v253_v32  ;;  %2198 = vmatmul.mubr.f32.gmra.mrb[2].mxu0 %v253_v32 }
 0x1d4   : > { %2186 = vmatprep.mubr.f32.mxu1 %v250_v28 }
 0x1d7   : > { %2187 = vmatmul.mubr.f32.vlgmr.msra.gmra.mrb[4].mxu1 %v251_v29  ;;  %v2871_v29 = vld [vmem:[%s3236_s1 + $0x168] sm:$0xff] }
 0x1d8   : > { %2189 = vmatprep.mubr.f32.mxu1 %v252_v30 }
 0x1db   : > { %2190 = vmatmul.mubr.f32.gmra.mrb[6].mxu1 %v253_v32 }
 0x2a2   : > { %v2180_v36 = vpop.f32.mrb[0].mxu1  ;;  %v2196_v37 = vpop.f32.mrb[0].mxu0 }
 0x2a3   : > { %v496_v38 = vadd.f32 %v2196_v37, %v2762_v33  ;;  %v320_v39 = vpop.f32.mrb[1].mxu1  ;;  %v490_v40 = vpop.f32.mrb[1].mxu0  ;;  %v326_v7 = vadd.f32 %v2180_v36, %v2831_v5 }
 0x2a4   : > { %v321_v41 = vadd.f32 %v320_v39, %v2767_v34  ;;  %v491_v42 = vadd.f32 %v490_v40, %v2772_v35 }
 0x2a6   : > { %v2380_v45 = vpack.c.bf16 %v496_v38, %v491_v42  ;;  %v2183_v46 = vpop.f32.mrb[2].mxu1  ;;  %v2199_v47 = vpop.f32.mrb[2].mxu0  ;;  %2208 = vmatprep.mubr.msk.f32.mxu1 %vm509_vm3, %v321_v41 }
 0x2a7   : > { %v506_v48 = vadd.f32 %v2199_v47, %v2780_v43  ;;  %v330_v49 = vpop.f32.mrb[3].mxu1  ;;  %v500_v50 = vpop.f32.mrb[3].mxu0  ;;  %v336_v12 = vadd.f32 %v2183_v46, %v2842_v8 }
 0x2a8   : > { %v501_v51 = vadd.f32 %v500_v50, %v2785_v44  ;;  %2381 = vmatprep.subr.bf16.mxu0 %v2380_v45  ;;  %v331_v9 = vadd.f32 %v330_v49, %v2836_v6 }
 0x2a9   : > { %2383 = vmatpush3.bf16.msra.mxu0 %v2380_v45 }
 0x2aa   : > { %v2384_v54 = vpack.c.bf16 %v506_v48, %v501_v51  ;;  %v2188_v55 = vpop.f32.mrb[4].mxu1 }
 0x2ab   : > { %v411_v56 = vadd.f32 %v2188_v55, %v2793_v52  ;;  %v405_v57 = vpop.f32.mrb[5].mxu1 }
 0x2ac   : > { %v406_v58 = vadd.f32 %v405_v57, %v2798_v53  ;;  %2385 = vmatprep.subr.bf16.mxu0 %v2384_v54 }
 0x2ad   : > { %2387 = vmatpush3.bf16.msra.mxu0 %v2384_v54 }
 0x2ae   : > { %v2368_v62 = vpack.c.bf16 %v411_v56, %v406_v58  ;;  %v2191_v63 = vpop.f32.mrb[6].mxu1 }
 0x2af   : > { %v421_v1 = vadd.f32 %v2191_v63, %v2805_v59  ;;  %v415_v2 = vpop.f32.mrb[7].mxu1 }
 0x2b0   : > { %v416_v3 = vadd.f32 %v415_v2, %v2810_v60  ;;  %2370 = vmatprep.subr.msk.bf16.mxu1 %vm2814_vm4, %v2368_v62 }
 0x2b1   : > { %2373 = vmatpush3.bf16.xpose.msk.msra.mxu1 %vm2814_vm4, %v2368_v62 }
 0x2b2   : > { %v2374_v4 = vpack.c.bf16 %v421_v1, %v416_v3 }
 0x2b4   : > { %2376 = vmatprep.subr.msk.bf16.mxu1 %vm2814_vm4, %v2374_v4 }
 0x2b9   : > { %2379 = vmatpush3.bf16.xpose.msk.msra.mxu1 %vm2814_vm4, %v2374_v4 }
 0x2c0   : > { %2209 = vmatmul.mubr.msk.f32.vlgmr.msra.gmra.mrb[8].mxu1 %vm509_vm3, %v326_v7 }
 0x2c1   : > { %2211 = vmatprep.mubr.msk.f32.mxu1 %vm509_vm3, %v331_v9 }
 0x2c4   : > { %2212 = vmatmul.mubr.msk.f32.gmra.mrb[10].mxu1 %vm509_vm3, %v336_v12 }
 0x393   : > { %v2210_v18 = vpop.f32.mrb[8].mxu1 }
 0x394   : > { %v606_v19 = vadd.f32 %v2210_v18, %v2852_v14  ;;  %v600_v20 = vpop.f32.mrb[9].mxu1 }
 0x395   : > { %v601_v21 = vadd.f32 %v600_v20, %v2857_v17 }
 0x396   : > { %v622_v24 = vsel %vm218_vm0, %v606_v19, -inf }
 0x397   : > { %623 = vmax.xlane.f32.xlu0 %v622_v24  ;;  %v2213_v26 = vpop.f32.mrb[10].mxu1  ;;  %v619_v28 = vsel %vm218_vm0, %v601_v21, -inf }
 0x398   : > { %v610_v30 = vpop.f32.mrb[11].mxu1  ;;  %620 = vmax.xlane.f32.xlu1 %v619_v28  ;;  %v616_v36 = vadd.f32 %v2213_v26, %v2871_v29 }
 0x399   : > { %v611_v32 = vadd.f32 %v610_v30, %v2865_v25  ;;  %v174_v30 = vld [vmem:[%s3236_s1 + $0x38] sm:$0xff] }
 0x39a   : > { %v628_v38 = vsel %vm218_vm0, %v616_v36, -inf }
 0x39b   : > { %v625_v37 = vsel %vm218_vm0, %v611_v32, -inf }
 0x39c   : > { %626 = vmax.xlane.f32.xlu1 %v625_v37  ;;  %v176_v37 = vld [vmem:[%s3236_s1 + $0x48] sm:$0xff] }
 0x3a0   : > { %629 = vmax.xlane.f32.xlu1 %v628_v38  ;;  %v177_v38 = vld [vmem:[%s3236_s1 + $0x50] sm:$0xff] }
 0x424   : > { %v624_v39 = vpop.xlane.xlu0 %623 }
 0x425   : > { %v632_v40 = vsub.f32 %v606_v19, %v624_v39  ;;  %v621_v41 = vpop.xlane.xlu1 %620 }
 0x426   : > { %v631_v42 = vsub.f32 %v601_v21, %v621_v41 }
 0x427   : > { %v637_v45 = vmul.f32 1.442695, %v632_v40  ;;  %v2901_v40 = vpack.c.bf16 %v177_v38, %v176_v37 }
 0x428   : > { %v635_v46 = vmul.f32 1.442695, %v631_v42 }
 0x429   : > { %2510 = vpow2.f32 %v637_v45  ;;  %v627_v47 = vpop.xlane.xlu1 %626 }
 0x42a   : > { %v633_v48 = vsub.f32 %v611_v32, %v627_v47  ;;  %2512 = vpow2.f32 %v635_v46  ;;  %v175_v32 = vld [vmem:[%s3236_s1 + $0x40] sm:$0xff] }
 0x42c   : > { %v639_v49 = vmul.f32 1.442695, %v633_v48 }
 0x42d   : > { %v630_v50 = vpop.xlane.xlu1 %629 }
 0x42e   : > { %v634_v51 = vsub.f32 %v616_v36, %v630_v50  ;;  %2514 = vpow2.f32 %v639_v49  ;;  %v2891_v36 = vpack.c.bf16 %v175_v32, %v174_v30  ;;  %v2951_v30 = vld [vmem:[%s3236_s1 + $0x188] sm:$0xff] }
 0x430   : > { %v641_v54 = vmul.f32 1.442695, %v634_v51  ;;  %2389 = vmatprep.subr.bf16.mxu0 %v2891_v36 }
 0x432   : > { %2516 = vpow2.f32 %v641_v54 }
 0x433   : > { %v2511_v55 = vpop.eup %2510 }
 0x434   : > { %v646_v56 = vsel %vm218_vm0, %v2511_v55, 0.0  ;;  %v2513_v57 = vpop.eup %2512 }
 0x435   : > { %647 = vadd.xlane.f32.xlu1 %v646_v56  ;;  %v643_v58 = vsel %vm218_vm0, %v2513_v57, 0.0 }
 0x438   : > { %v2515_v62 = vpop.eup %2514 }
 0x439   : > { %644 = vadd.xlane.f32.xlu1 %v643_v58  ;;  %v649_v1 = vsel %vm218_vm0, %v2515_v62, 0.0  ;;  %v2923_v58 = vld [vmem:[%s3236_s1 + $0x170] sm:$0xff] }
 0x43c   : > { %v2517_v63 = vpop.eup %2516 }
 0x43d   : > { %650 = vadd.xlane.f32.xlu1 %v649_v1  ;;  %v652_v2 = vsel %vm218_vm0, %v2517_v63, 0.0 }
 0x43e   : > { %653 = vadd.xlane.f32.xlu0 %v652_v2 }
 0x4c2   : > { %v648_v3 = vpop.xlane.xlu1 %647 }
 0x4c3   : > { %2518 = vrcp.f32 %v648_v3 }
 0x4c6   : > { %v645_v4 = vpop.xlane.xlu1 %644 }
 0x4c7   : > { %2520 = vrcp.f32 %v645_v4 }
 0x4ca   : > { %v651_v7 = vpop.xlane.xlu1 %650 }
 0x4cb   : > { %2522 = vrcp.f32 %v651_v7  ;;  %v654_v9 = vpop.xlane.xlu0 %653 }
 0x4cc   : > { %2524 = vrcp.f32 %v654_v9  ;;  %v2938_v9 = vld [vmem:[%s3236_s1 + $0x180] sm:$0xff] }
 0x4cd   : > { %v2519_v12 = vpop.eup %2518 }
 0x4ce   : > { %v658_v20 = vmul.f32 %v2519_v12, %v2511_v55 }
 0x4d1   : > { %v2521_v18 = vpop.eup %2520 }
 0x4d2   : > { %v656_v19 = vmul.f32 %v2521_v18, %v2513_v57 }
 0x4d4   : > { %2222 = vmatprep.mubr.msk.f32.mxu0 %vm218_vm0, %v656_v19 }
 0x4d5   : > { %v2523_v21 = vpop.eup %2522  ;;  %2223 = vmatmul.mubr.msk.f32.vlgmr.msra.gmra.mrb[4].mxu0 %vm218_vm0, %v658_v20 }
 0x4d6   : > { %v2525_v24 = vpop.eup %2524  ;;  %v660_v26 = vmul.f32 %v2523_v21, %v2515_v62  ;;  %2391 = vmatpush3.bf16.msra.mxu0 %v2891_v36 }
 0x4d7   : > { %v662_v28 = vmul.f32 %v2525_v24, %v2517_v63  ;;  %2393 = vmatprep.subr.bf16.mxu0 %v2901_v40  ;;  %v2928_v63 = vld [vmem:[%s3236_s1 + $0x178] sm:$0xff] }
 0x4d8   : > { %2225 = vmatprep.mubr.msk.f32.mxu0 %vm218_vm0, %v660_v26 }
 0x4d9   : > { %2226 = vmatmul.mubr.msk.f32.gmra.mrb[6].mxu0 %vm218_vm0, %v662_v28 }
 0x4da   : > { %2395 = vmatpush3.bf16.msra.mxu0 %v2901_v40 }
 0x5a8   : > { %v2224_v39 = vpop.f32.mrb[4].mxu0 }
 0x5a9   : > { %778 = vrot.lane.b32.xlu1 %v2224_v39, %s2615_s17  ;;  %766 = vrot.lane.b32.xlu0 %v2224_v39, %s2616_s21  ;;  %v741_v41 = vpop.f32.mrb[5].mxu0 }
 0x5ac   : > { %v2227_v42 = vpop.f32.mrb[6].mxu0 }
 0x5ad   : > { %790 = vrot.lane.b32.xlu1 %v2224_v39, %s2617_s22  ;;  %788 = vrot.lane.b32.xlu0 %v741_v41, %s2617_s22  ;;  %v751_v45 = vpop.f32.mrb[7].mxu0 }
 0x5b1   : > { %764 = vrot.lane.b32.xlu1 %v741_v41, %s2616_s21  ;;  %768 = vrot.lane.b32.xlu0 %v751_v45, %s2616_s21 }
 0x5b5   : > { %776 = vrot.lane.b32.xlu1 %v741_v41, %s2615_s17  ;;  %780 = vrot.lane.b32.xlu0 %v751_v45, %s2615_s17 }
 0x5b9   : > { %770 = vrot.lane.b32.xlu1 %v2227_v42, %s2616_s21  ;;  %792 = vrot.lane.b32.xlu0 %v751_v45, %s2617_s22 }
 0x5bd   : > { %782 = vrot.lane.b32.xlu1 %v2227_v42, %s2615_s17 }
 0x5c1   : > { %794 = vrot.lane.b32.xlu1 %v2227_v42, %s2617_s22 }
 0x61b   : > { %v767_v46 = vpop.permute.xlu0 %766  ;;  %v779_v47 = vpop.permute.xlu1 %778 }
 0x61c   : > { %v801_v54 = vsel %vm509_vm3, %v2224_v39, %v767_v46 }
 0x61d   : > { %v806_v55 = vsel %vm804_vm5, %v801_v54, %v779_v47 }
 0x61f   : > { %v789_v48 = vpop.permute.xlu0 %788  ;;  %v791_v49 = vpop.permute.xlu1 %790 }
 0x620   : > { %v811_v1 = vsel %vm809_vm6, %v806_v55, %v791_v49 }
 0x621   : > { %v815_v12 = vmul.f32 %v811_v1, %v2928_v63 }
 0x623   : > { %v769_v50 = vpop.permute.xlu0 %768  ;;  %v765_v51 = vpop.permute.xlu1 %764 }
 0x624   : > { %v800_v56 = vsel %vm509_vm3, %v741_v41, %v765_v51  ;;  %v802_v4 = vsel %vm509_vm3, %v751_v45, %v769_v50  ;;  %v2960_v50 = vld [vmem:[%s3236_s1 + $0x20] ss:$0 sm:$0xff] }
 0x627   : > { %v781_v57 = vpop.permute.xlu0 %780  ;;  %v777_v62 = vpop.permute.xlu1 %776 }
 0x628   : > { %v805_v2 = vsel %vm804_vm5, %v800_v56, %v777_v62  ;;  %v807_v18 = vsel %vm804_vm5, %v802_v4, %v781_v57 }
 0x629   : > { %v810_v3 = vsel %vm809_vm6, %v805_v2, %v789_v48 }
 0x62a   : > { %v814_v7 = vmul.f32 %v810_v3, %v2923_v58  ;;  %v178_v3 = vld [vmem:[%s3236_s1 + $0x58] sm:$0xff] }
 0x62b   : > { %v793_v19 = vpop.permute.xlu0 %792  ;;  %v771_v20 = vpop.permute.xlu1 %770 }
 0x62c   : > { %v812_v21 = vsel %vm809_vm6, %v807_v18, %v793_v19  ;;  %2236 = vmatprep.mubr.msk.f32.mxu0 %vm218_vm0, %v814_v7  ;;  %v803_v28 = vsel %vm509_vm3, %v2227_v42, %v771_v20  ;;  %v2618_v7 = vmov 0.0|0.0   ;;  %v181_v18 = vld [vmem:[%s3236_s1 + $0x70] sm:$0xff]  ;;  %v2620_v20 = vmov 0.0  }
 0x62d   : > { %v816_v24 = vmul.f32 %v812_v21, %v2938_v9  ;;  %2237 = vmatmul.mubr.msk.f32.vlgmr.msra.gmra.mrb[8].mxu0 %vm218_vm0, %v815_v12  ;;  %2396 = vmatprep.subr.bf16.mxu1 %v2618_v7  ;;  %v180_v12 = vld [vmem:[%s3236_s1 + $0x68] sm:$0xff]  ;;  %v182_v21 = vld [vmem:[%s3236_s1 + $0x78] sm:$0xff] }
 0x62e   : > { %2402 = vmatprep.subr.bf16.mxu0 %v2618_v7  ;;  %v2988_v19 = vpack.c.bf16 %v181_v18, %v180_v12  ;;  %2250 = vmatprep.mubr.msk.f32.mxu1 %vm2619_vm7, %v2620_v20  ;;  %v3062_v18 = vld [vmem:[%s3236_s1 + $0x28] ss:$0 sm:$0xff] }
 0x62f   : > { %2239 = vmatprep.mubr.msk.f32.mxu0 %vm218_vm0, %v816_v24  ;;  %v783_v26 = vpop.permute.xlu1 %782  ;;  %v183_v24 = vld [vmem:[%s3236_s1 + $0x80] sm:$0xff] }
 0x630   : > { %v808_v32 = vsel %vm804_vm5, %v803_v28, %v783_v26  ;;  %v184_v26 = vld [vmem:[%s3236_s1 + $0x88] sm:$0xff]  ;;  %v3005_v28 = vpack.c.bf16 %v183_v24, %v182_v21 }
 0x632   : > { %2404 = vmatpush3.bf16.msra.mxu0 %v3005_v28 }
 0x633   : > { %v795_v37 = vpop.permute.xlu1 %794  ;;  %2405 = vmatprep.subr.bf16.mxu0 %v2618_v7 }
 0x634   : > { %v813_v38 = vsel %vm809_vm6, %v808_v32, %v795_v37  ;;  %v185_v32 = vld [vmem:[%s3236_s1 + $0x90] sm:$0xff] }
 0x635   : > { %v817_v39 = vmul.f32 %v813_v38, %v2951_v30  ;;  %v3011_v37 = vpack.c.bf16 %v185_v32, %v184_v26  ;;  %v186_v38 = vld [vmem:[%s3236_s1 + $0x98] sm:$0xff] }
 0x637   : > { %2240 = vmatmul.mubr.msk.f32.gmra.mrb[10].mxu0 %vm218_vm0, %v817_v39  ;;  %v187_v39 = vld [vmem:[%s3236_s1 + $0xa0] sm:$0xff] }
 0x638   : > { %2269 = vmatprep.mubr.msk.f32.mxu0 %vm2619_vm7, %v2620_v20  ;;  %2407 = vmatpush3.bf16.msra.mxu0 %v3011_v37 }
 0x639   : > { %2408 = vmatprep.subr.bf16.mxu0 %v2618_v7 }
 0x700   : > { %v2238_v41 = vpop.f32.mrb[8].mxu0 }
 0x701   : > { %v896_v45 = vpop.f32.mrb[9].mxu0 }
 0x702   : > { %v915_v46 = vadd.f32 %v2238_v41, %v896_v45  ;;  %v3021_v41 = vpack.c.bf16 %v187_v39, %v186_v38 }
 0x704   : > { %2410 = vmatpush3.bf16.msra.mxu0 %v3021_v41 }
 0x705   : > { %2411 = vmatprep.subr.bf16.mxu0 %v2618_v7 }
 0x70a   : > { %v2241_v47 = vpop.f32.mrb[10].mxu0 }
 0x70b   : > { %v906_v48 = vpop.f32.mrb[11].mxu0 }
 0x70c   : > { %v916_v42 = vadd.f32 %v915_v46, %v906_v48 }
 0x70e   : > { %v917_v49 = vadd.f32 %v2241_v47, %v916_v42  ;;  %v3029_v42 = vld [vmem:[%s3236_s1 + $0x10] ss:$0 sm:$0xff] }
 0x710   : > { %v918_v51 = vadd.f32 %v917_v49, %v2690_v0  ;;  %v179_v0 = vld [vmem:[%s3236_s1 + $0x60] sm:$0xff] }
 0x711   : > { %v2976_v4 = vpack.c.bf16 %v179_v0, %v178_v3 }
 0x712   : > { %v2964_v54 = vadd.f32 %v2960_v50, %v918_v51  ;;  %v3034_v51 = vld [vmem:[%s3236_s1 + $0x18] ss:$0 sm:$0xff] }
 0x713   : > { %2398 = vmatpush3.bf16.msra.mxu1 %v2976_v4 }
 0x714   : > { %v920_v55 = vsel %vm218_vm0, %v2964_v54, 0.0  ;;  %2399 = vmatprep.subr.bf16.mxu1 %v2618_v7 }
 0x715   : > { %921 = vadd.xlane.f32.xlu0 %v920_v55 }
 0x717   : > { %2401 = vmatpush3.bf16.msra.mxu1 %v2988_v19 }
 0x718   : > { %2272 = vmatprep.subr.mxu1 %v2699_v10 }
 0x7a2   : > { %v922_v56 = vpop.xlane.xlu0 %921 }
 0x7a3   : > { %v923_v57 = vmul.f32 0.03125, %v922_v56 }
 0x7a5   : > { %v924_v62 = vsub.f32 %v2964_v54, %v923_v57  ;;  %v188_v57 = vld [vmem:[%s3236_s1 + $0xa8] sm:$0xff] }
 0x7a7   : > { %v925_v1 = vmul.f32 %v924_v62, %v924_v62 }
 0x7a9   : > { %v926_v2 = vsel %vm218_vm0, %v925_v1, 0.0 }
 0x7aa   : > { %927 = vadd.xlane.f32.xlu1 %v926_v2 }
 0x837   : > { %v928_v45 = vpop.xlane.xlu1 %927 }
 0x838   : > { %v929_v46 = vmul.f32 0.03125, %v928_v45 }
 0x83a   : > { %v930_v47 = vadd.f32 1e-05, %v929_v46 }
 0x83c   : > { %2526 = vrsqrt.f32 %v930_v47 }
 0x846   : > { %v2527_v48 = vpop.eup %2526 }
 0x847   : > { %v932_v49 = vmul.f32 %v2527_v48, %v924_v62  ;;  %v189_v62 = vld [vmem:[%s3236_s1 + $0xb0] sm:$0xff] }
 0x848   : > { %v3047_v1 = vpack.c.bf16 %v189_v62, %v188_v57 }
 0x849   : > { %v933_v55 = vmul.f32 %v3029_v42, %v932_v49 }
 0x84a   : > { %2413 = vmatpush3.bf16.msra.mxu0 %v3047_v1 }
 0x84b   : > { %v934_v56 = vadd.f32 %v3034_v51, %v933_v55  ;;  %2288 = vmatprep.subr.mxu0 %v2704_v11 }
 0x84d   : > { %2251 = vmatmul.mubr.msk.f32.vlgmr.msra.gmra.mrb[12].mxu1 %vm218_vm0, %v934_v56 }
 0x84e   : > { %2273 = vmatpush3.xpose.msra.mxu1 %v2699_v10  ;;  %v3054_v10 = vld [vmem:[%s3236_s1 + $0x30] ss:$0 sm:$0xff] }
 0x84f   : > { %2280 = vmatprep.subr.mxu1 %v2723_v16 }
 0x920   : > { %v1004_v2 = vpop.f32.mrb[12].mxu1 }
 0x921   : > { %v1005_v3 = vadd.f32 %v3054_v10, %v1004_v2  ;;  %v2252_v0 = vpop.f32.mrb[13].mxu1 }
 0x923   : > { %v1008_v12 = vmax.f32 %v1005_v3, 0.0 }
 0x925   : > { %2270 = vmatmul.mubr.msk.f32.vlgmr.msra.gmra.mrb[12].mxu0 %vm246_vm1, %v1008_v12 }
 0x926   : > { %2289 = vmatpush3.xpose.msra.mxu0 %v2704_v11 }
 0x9f8   : > { %v1078_v21 = vpop.f32.mrb[12].mxu0 }
 0x9f9   : > { %v1082_v24 = vadd.f32 %v1078_v21, %v2964_v54  ;;  %v2271_v26 = vpop.f32.mrb[13].mxu0 }
 0x9fb   : > { %v3066_v32 = vadd.f32 %v3062_v18, %v1082_v24 }
 0x9fd   : > { %v1084_v38 = vsel %vm218_vm0, %v3066_v32, 0.0 }
 0x9fe   : > { %1085 = vadd.xlane.f32.xlu0 %v1084_v38 }
 0xa8b   : > { %v1086_v39 = vpop.xlane.xlu0 %1085 }
 0xa8c   : > { %v1087_v45 = vmul.f32 0.03125, %v1086_v39 }
 0xa8e   : > { %v1088_v11 = vsub.f32 %v3066_v32, %v1087_v45 }
 0xa90   : > { %v1089_v46 = vmul.f32 %v1088_v11, %v1088_v11 }
 0xa92   : > { %v1090_v47 = vsel %vm218_vm0, %v1089_v46, 0.0 }
 0xa93   : > { %1091 = vadd.xlane.f32.xlu0 %v1090_v47 }
 0xb20   : > { %v1092_v48 = vpop.xlane.xlu0 %1091 }
 0xb21   : > { %v1093_v49 = vmul.f32 0.03125, %v1092_v48 }
 0xb23   : > { %v1094_v55 = vadd.f32 1e-05, %v1093_v49 }
 0xb25   : > { %2528 = vrsqrt.f32 %v1094_v55 }
 0xb2f   : > { %v2529_v54 = vpop.eup %2528 }
 0xb30   : > { %v1096_v56 = vmul.f32 %v2529_v54, %v1088_v11 }
 0xb32   : > { %v1097_v57 = vmul.f32 %v2711_v13, %v1096_v56 }
 0xb34   : > { %v1098_v62 = vadd.f32 %v2718_v15, %v1097_v57 }
 0xb36   : > { %1103 = vrot.lane.b32.xlu0 %v1098_v62, %s2614_s16  ;;  %1100 = vrot.lane.b32.xlu1 %v1098_v62, %s2613_s14  ;;  %s2067_s16 = sshll.u32 %s2658_s13, 7 }
 0xb37   : > { %s3192_s27 = scalar_lea.hbm %s3237_s2, %s2067_s16 }
 0xb3a   : > { %1106 = vrot.lane.b32.xlu1 %v1098_v62, %s2612_s8  ;;  %s132_s8 = sand.u32 1, %s2602_s10  }
 0xb3b   : > { %s2021_s14 = sshll.u32 %s132_s8, 3  ;;  %s1945_s28 = scalar_lea.sflag [#allocation3], %s132_s8 }
 0xba8   : > { %v1101_v2 = vpop.permute.xlu1 %1100  ;;  %v1104_v3 = vpop.permute.xlu0 %1103 }
 0xba9   : > { %v1109_v0 = vsel %vm218_vm0, %v1098_v62, %v1101_v2 }
 0xbaa   : > { %v1110_v12 = vsel %vm246_vm1, %v1109_v0, %v1104_v3 }
 0xbac   : > { %v1107_v21 = vpop.permute.xlu1 %1106 }
 0xbad   : > { %v1111_v24 = vsel %vm248_vm2, %v1110_v12, %v1107_v21 }
 0xbae   : > { %v1113_v26 = vmul.f32 %v1111_v24, %v2740_v23  ;;  %v1112_v13 = vmul.f32 %v1111_v24, %v2735_v22  ;;  %v1114_v15 = vmul.f32 %v1111_v24, %v2747_v27  ;;  %v1115_v38 = vmul.f32 %v1111_v24, %v2755_v31 }
 0xbb0   : > { %2274 = vmatprep.mubr.f32.mxu1 %v1112_v13  ;;  %2290 = vmatprep.mubr.f32.mxu0 %v1112_v13 }
 0xbb1   : > { %2275 = vmatmul.mubr.f32.vlgmr.msra.gmra.mrb[14].mxu1 %v1113_v26  ;;  %2291 = vmatmul.mubr.f32.vlgmr.msra.gmra.mrb[14].mxu0 %v1113_v26 }
 0xbb2   : > { %2281 = vmatpush3.xpose.msra.mxu1 %v2723_v16  ;;  %2277 = vmatprep.mubr.f32.mxu1 %v1114_v15 }
 0xbb3   : > { %2293 = vmatprep.mubr.f32.mxu0 %v1114_v15 }
 0xbb5   : > { %2278 = vmatmul.mubr.f32.gmra.mrb[16].mxu1 %v1115_v38  ;;  %2294 = vmatmul.mubr.f32.gmra.mrb[16].mxu0 %v1115_v38 }
 0xbb6   : > { %2282 = vmatprep.mubr.f32.mxu1 %v1112_v13 }
 0xbb9   : > { %2283 = vmatmul.mubr.f32.vlgmr.msra.gmra.mrb[18].mxu1 %v1113_v26 }
 0xbba   : > { %2285 = vmatprep.mubr.f32.mxu1 %v1114_v15 }
 0xbbd   : > { %2286 = vmatmul.mubr.f32.gmra.mrb[20].mxu1 %v1115_v38 }
 0xc84   : > { %v2276_v23 = vpop.f32.mrb[14].mxu1  ;;  %v2292_v22 = vpop.f32.mrb[14].mxu0 }
 0xc85   : > { %v1358_v39 = vadd.f32 %v2292_v22, %v2762_v33  ;;  %v1182_v45 = vpop.f32.mrb[15].mxu1  ;;  %v1352_v27 = vpop.f32.mrb[15].mxu0 }
 0xc86   : > { %v1183_v11 = vadd.f32 %v1182_v45, %v2767_v34  ;;  %v1353_v16 = vadd.f32 %v1352_v27, %v2772_v35 }
 0xc88   : > { %v2426_v46 = vpack.c.bf16 %v1358_v39, %v1353_v16  ;;  %v2279_v47 = vpop.f32.mrb[16].mxu1  ;;  %v2295_v48 = vpop.f32.mrb[16].mxu0  ;;  %2304 = vmatprep.mubr.msk.f32.mxu1 %vm509_vm3, %v1183_v11 }
 0xc89   : > { %v1368_v31 = vadd.f32 %v2295_v48, %v2780_v43  ;;  %v1192_v49 = vpop.f32.mrb[17].mxu1  ;;  %v1362_v55 = vpop.f32.mrb[17].mxu0 }
 0xc8a   : > { %v1363_v54 = vadd.f32 %v1362_v55, %v2785_v44  ;;  %2427 = vmatprep.subr.bf16.mxu0 %v2426_v46 }
 0xc8b   : > { %2429 = vmatpush3.bf16.msra.mxu0 %v2426_v46 }
 0xc8c   : > { %v2430_v33 = vpack.c.bf16 %v1368_v31, %v1363_v54  ;;  %v2284_v56 = vpop.f32.mrb[18].mxu1 }
 0xc8d   : > { %v1273_v57 = vadd.f32 %v2284_v56, %v2793_v52  ;;  %v1267_v34 = vpop.f32.mrb[19].mxu1 }
 0xc8e   : > { %v1268_v35 = vadd.f32 %v1267_v34, %v2798_v53  ;;  %2431 = vmatprep.subr.bf16.mxu0 %v2430_v33  ;;  %v1188_v53 = vadd.f32 %v2276_v23, %v2831_v5 }
 0xc8f   : > { %2433 = vmatpush3.bf16.msra.mxu0 %v2430_v33 }
 0xc90   : > { %v2414_v62 = vpack.c.bf16 %v1273_v57, %v1268_v35  ;;  %v2287_v2 = vpop.f32.mrb[20].mxu1  ;;  %2435 = vmatprep.subr.bf16.mxu0 %v2891_v36 }
 0xc91   : > { %v1283_v43 = vadd.f32 %v2287_v2, %v2805_v59  ;;  %v1277_v3 = vpop.f32.mrb[21].mxu1  ;;  %v1193_v59 = vadd.f32 %v1192_v49, %v2836_v6 }
 0xc92   : > { %v1278_v44 = vadd.f32 %v1277_v3, %v2810_v60  ;;  %2416 = vmatprep.subr.msk.bf16.mxu1 %vm2814_vm4, %v2414_v62  ;;  %v1198_v60 = vadd.f32 %v2279_v47, %v2842_v8 }
 0xc93   : > { %2419 = vmatpush3.bf16.xpose.msk.msra.mxu1 %vm2814_vm4, %v2414_v62 }
 0xc94   : > { %v2420_v52 = vpack.c.bf16 %v1283_v43, %v1278_v44 }
 0xc96   : > { %2422 = vmatprep.subr.msk.bf16.mxu1 %vm2814_vm4, %v2420_v52 }
 0xc9b   : > { %2425 = vmatpush3.bf16.xpose.msk.msra.mxu1 %vm2814_vm4, %v2420_v52 }
 0xc9c   : > { %2442 = vmatprep.subr.bf16.mxu1 %v2618_v7 }
 0xca2   : > { %2305 = vmatmul.mubr.msk.f32.vlgmr.msra.gmra.mrb[22].mxu1 %vm509_vm3, %v1188_v53 }
 0xca3   : > { %2307 = vmatprep.mubr.msk.f32.mxu1 %vm509_vm3, %v1193_v59  ;;  %2444 = vmatpush3.bf16.msra.mxu1 %v2976_v4 }
 0xca4   : > { %2445 = vmatprep.subr.bf16.mxu1 %v2618_v7 }
 0xca6   : > { %2308 = vmatmul.mubr.msk.f32.gmra.mrb[24].mxu1 %vm509_vm3, %v1198_v60 }
 0xca7   : > { %2447 = vmatpush3.bf16.msra.mxu1 %v2988_v19  ;;  %2346 = vmatprep.mubr.msk.f32.mxu1 %vm2619_vm7, %v2620_v20 }
 0xd75   : > { %v2306_v61 = vpop.f32.mrb[22].mxu1 }
 0xd76   : > { %v1467_v5 = vadd.f32 %v2306_v61, %v2852_v14  ;;  %v1461_v6 = vpop.f32.mrb[23].mxu1 }
 0xd77   : > { %v1462_v0 = vadd.f32 %v1461_v6, %v2857_v17 }
 0xd78   : > { %v1483_v12 = vsel %vm218_vm0, %v1467_v5, -inf }
 0xd79   : > { %1484 = vmax.xlane.f32.xlu0 %v1483_v12  ;;  %v2309_v4 = vpop.f32.mrb[24].mxu1  ;;  %v1480_v8 = vsel %vm218_vm0, %v1462_v0, -inf }
 0xd7a   : > { %v1477_v21 = vadd.f32 %v2309_v4, %v2871_v29  ;;  %v1471_v24 = vpop.f32.mrb[25].mxu1  ;;  %1481 = vmax.xlane.f32.xlu1 %v1480_v8 }
 0xd7b   : > { %v1472_v19 = vadd.f32 %v1471_v24, %v2865_v25 }
 0xd7c   : > { %v1489_v26 = vsel %vm218_vm0, %v1477_v21, -inf }
 0xd7d   : > { %v1486_v13 = vsel %vm218_vm0, %v1472_v19, -inf }
 0xd7e   : > { %1487 = vmax.xlane.f32.xlu0 %v1486_v13  ;;  %1490 = vmax.xlane.f32.xlu1 %v1489_v26 }
 0xe06   : > { %v1485_v14 = vpop.xlane.xlu0 %1484 }
 0xe07   : > { %v1493_v17 = vsub.f32 %v1467_v5, %v1485_v14  ;;  %v1482_v15 = vpop.xlane.xlu1 %1481 }
 0xe08   : > { %v1492_v38 = vsub.f32 %v1462_v0, %v1482_v15 }
 0xe09   : > { %v1498_v23 = vmul.f32 1.442695, %v1493_v17 }
 0xe0a   : > { %v1496_v22 = vmul.f32 1.442695, %v1492_v38 }
 0xe0b   : > { %2530 = vpow2.f32 %v1498_v23  ;;  %v1488_v39 = vpop.xlane.xlu0 %1487  ;;  %v1491_v45 = vpop.xlane.xlu1 %1490 }
 0xe0c   : > { %2532 = vpow2.f32 %v1496_v22  ;;  %v1494_v29 = vsub.f32 %v1472_v19, %v1488_v39  ;;  %v1495_v27 = vsub.f32 %v1477_v21, %v1491_v45 }
 0xe0e   : > { %v1500_v11 = vmul.f32 1.442695, %v1494_v29  ;;  %v1502_v25 = vmul.f32 1.442695, %v1495_v27 }
 0xe10   : > { %2534 = vpow2.f32 %v1500_v11 }
 0xe11   : > { %2536 = vpow2.f32 %v1502_v25 }
 0xe15   : > { %v2531_v16 = vpop.eup %2530 }
 0xe16   : > { %v2533_v46 = vpop.eup %2532  ;;  %v1507_v47 = vsel %vm218_vm0, %v2531_v16, 0.0 }
 0xe17   : > { %1508 = vadd.xlane.f32.xlu1 %v1507_v47  ;;  %v1504_v48 = vsel %vm218_vm0, %v2533_v46, 0.0 }
 0xe18   : > { %1505 = vadd.xlane.f32.xlu0 %v1504_v48 }
 0xe1a   : > { %v2535_v31 = vpop.eup %2534 }
 0xe1b   : > { %v2537_v49 = vpop.eup %2536  ;;  %v1510_v55 = vsel %vm218_vm0, %v2535_v31, 0.0 }
 0xe1c   : > { %1511 = vadd.xlane.f32.xlu0 %v1510_v55  ;;  %v1513_v54 = vsel %vm218_vm0, %v2537_v49, 0.0 }
 0xe1d   : > { %1514 = vadd.xlane.f32.xlu1 %v1513_v54 }
 0xea4   : > { %v1509_v33 = vpop.xlane.xlu1 %1508 }
 0xea5   : > { %2538 = vrcp.f32 %v1509_v33  ;;  %v1506_v56 = vpop.xlane.xlu0 %1505 }
 0xea6   : > { %2540 = vrcp.f32 %v1506_v56 }
 0xea9   : > { %v1512_v57 = vpop.xlane.xlu0 %1511 }
 0xeaa   : > { %2542 = vrcp.f32 %v1512_v57  ;;  %v1515_v34 = vpop.xlane.xlu1 %1514 }
 0xeab   : > { %2544 = vrcp.f32 %v1515_v34 }
 0xeaf   : > { %v2539_v35 = vpop.eup %2538 }
 0xeb0   : > { %v2541_v62 = vpop.eup %2540  ;;  %v1519_v43 = vmul.f32 %v2539_v35, %v2531_v16 }
 0xeb1   : > { %v1517_v2 = vmul.f32 %v2541_v62, %v2533_v46 }
 0xeb3   : > { %2318 = vmatprep.mubr.msk.f32.mxu0 %vm218_vm0, %v1517_v2 }
 0xeb4   : > { %v2543_v3 = vpop.eup %2542  ;;  %2319 = vmatmul.mubr.msk.f32.vlgmr.msra.gmra.mrb[18].mxu0 %vm218_vm0, %v1519_v43 }
 0xeb5   : > { %v2545_v44 = vpop.eup %2544  ;;  %v1521_v52 = vmul.f32 %v2543_v3, %v2535_v31  ;;  %2437 = vmatpush3.bf16.msra.mxu0 %v2891_v36 }
 0xeb6   : > { %v1523_v53 = vmul.f32 %v2545_v44, %v2537_v49  ;;  %2439 = vmatprep.subr.bf16.mxu0 %v2901_v40 }
 0xeb7   : > { %2321 = vmatprep.mubr.msk.f32.mxu0 %vm218_vm0, %v1521_v52 }
 0xeb8   : > { %2322 = vmatmul.mubr.msk.f32.gmra.mrb[20].mxu0 %vm218_vm0, %v1523_v53 }
 0xeb9   : > { %2441 = vmatpush3.bf16.msra.mxu0 %v2901_v40 }
 0xeba   : > { %2448 = vmatprep.subr.bf16.mxu0 %v2618_v7 }
 0xf87   : > { %v2320_v59 = vpop.f32.mrb[18].mxu0 }
 0xf88   : > { %1639 = vrot.lane.b32.xlu0 %v2320_v59, %s2615_s17  ;;  %1627 = vrot.lane.b32.xlu1 %v2320_v59, %s2616_s21  ;;  %v1602_v60 = vpop.f32.mrb[19].mxu0 }
 0xf8b   : > { %v2323_v61 = vpop.f32.mrb[20].mxu0 }
 0xf8c   : > { %1651 = vrot.lane.b32.xlu0 %v2320_v59, %s2617_s22  ;;  %1637 = vrot.lane.b32.xlu1 %v1602_v60, %s2615_s17  ;;  %v1612_v36 = vpop.f32.mrb[21].mxu0 }
 0xf90   : > { %1649 = vrot.lane.b32.xlu1 %v1602_v60, %s2617_s22  ;;  %1625 = vrot.lane.b32.xlu0 %v1602_v60, %s2616_s21 }
 0xf94   : > { %1631 = vrot.lane.b32.xlu0 %v2323_v61, %s2616_s21  ;;  %1629 = vrot.lane.b32.xlu1 %v1612_v36, %s2616_s21 }
 0xf98   : > { %1643 = vrot.lane.b32.xlu0 %v2323_v61, %s2615_s17  ;;  %1641 = vrot.lane.b32.xlu1 %v1612_v36, %s2615_s17  ;;  %s134_s17 = scalar_lea.vmem [#allocation2], %s2021_s14 }
 0xf99   : > { %s1958_s21 = sshll.u32 %s134_s17, 4  ;;  %s3194_s21 = int_to_ptr.vmem [resolvable:$true] %s1958_s21 }
 0xf9a   : > { %s2548_s13 = scalar_lea.vmem %s3194_s21, 128  ;;  %p2555_p0 = scmp.lt.s32.totalorder %s3194_s21, %s2553_s30 }
 0xf9b   : > { %p2549_p11 = scmp.ne.s32.totalorder %s3194_s21, %s2548_s13  ;;  %p2556_p1 = scmp.lt.s32.totalorder %s2554_s3, %s2548_s13 }
 0xf9c   : > { %1655 = vrot.lane.b32.xlu0 %v2323_v61, %s2617_s22  ;;  %1653 = vrot.lane.b32.xlu1 %v1612_v36, %s2617_s22 }
 0xf9d   : > { %p2550_p12 = pnand %p2549_p11, %p2675_p5  ;;  %p2557_p2 = por %p2556_p1, %p2555_p0 }
 0xf9f   : > { %p2551_p13 = pneg %p2550_p12 }
 0xfa1   : > { %p2558_p3 = pnand %p2557_p2, %p2551_p13 }
 0xffa   : > { %v1640_v40 = vpop.permute.xlu0 %1639  ;;  %v1628_v5 = vpop.permute.xlu1 %1627 }
 0xffb   : > { %v1662_v12 = vsel %vm509_vm3, %v2320_v59, %v1628_v5 }
 0xffc   : > { %v1666_v21 = vsel %vm804_vm5, %v1662_v12, %v1640_v40 }
 0xffe   : > { %v1652_v6 = vpop.permute.xlu0 %1651  ;;  %v1638_v0 = vpop.permute.xlu1 %1637 }
 0xfff   : > { %v1670_v19 = vsel %vm809_vm6, %v1666_v21, %v1652_v6 }
0x1000   : > { %v1674_v38 = vmul.f32 %v1670_v19, %v2928_v63 }
0x1002   : > { %v1626_v4 = vpop.permute.xlu0 %1625  ;;  %v1650_v8 = vpop.permute.xlu1 %1649 }
0x1003   : > { %v1661_v24 = vsel %vm509_vm3, %v1602_v60, %v1626_v4 }
0x1004   : > { %v1665_v26 = vsel %vm804_vm5, %v1661_v24, %v1638_v0 }
0x1005   : > { %v1669_v13 = vsel %vm809_vm6, %v1665_v26, %v1650_v8 }
0x1006   : > { %v1673_v14 = vmul.f32 %v1669_v13, %v2923_v58  ;;  %v1632_v17 = vpop.permute.xlu0 %1631  ;;  %v1630_v15 = vpop.permute.xlu1 %1629 }
0x1007   : > { %v1664_v39 = vsel %vm509_vm3, %v2323_v61, %v1632_v17  ;;  %v1663_v45 = vsel %vm509_vm3, %v1612_v36, %v1630_v15 }
0x1008   : > { %2332 = vmatprep.mubr.msk.f32.mxu0 %vm218_vm0, %v1673_v14 }
0x1009   : > { %2333 = vmatmul.mubr.msk.f32.vlgmr.msra.gmra.mrb[22].mxu0 %vm218_vm0, %v1674_v38 }
0x100a   : > { %v1644_v23 = vpop.permute.xlu0 %1643  ;;  %v1642_v22 = vpop.permute.xlu1 %1641  ;;  %2450 = vmatpush3.bf16.msra.mxu0 %v3005_v28 }
0x100b   : > { %2451 = vmatprep.subr.bf16.mxu0 %v2618_v7  ;;  %v1668_v58 = vsel %vm804_vm5, %v1664_v39, %v1644_v23  ;;  %v1667_v29 = vsel %vm804_vm5, %v1663_v45, %v1642_v22 }
0x100e   : > { %v1656_v27 = vpop.permute.xlu0 %1655  ;;  %v1654_v63 = vpop.permute.xlu1 %1653  ;;  %2453 = vmatpush3.bf16.msra.mxu0 %v3011_v37 }
0x100f   : > { %v1672_v11 = vsel %vm809_vm6, %v1668_v58, %v1656_v27  ;;  %v1671_v25 = vsel %vm809_vm6, %v1667_v29, %v1654_v63  ;;  %2454 = vmatprep.subr.bf16.mxu0 %v2618_v7 }
0x1010   : > { %v1676_v28 = vmul.f32 %v1672_v11, %v2951_v30  ;;  %v1675_v16 = vmul.f32 %v1671_v25, %v2938_v9 }
0x1012   : > { %2335 = vmatprep.mubr.msk.f32.mxu0 %vm218_vm0, %v1675_v16  ;;  %2456 = vmatpush3.bf16.msra.mxu0 %v3021_v41 }
0x1013   : > { %2336 = vmatmul.mubr.msk.f32.gmra.mrb[24].mxu0 %vm218_vm0, %v1676_v28  ;;  %2457 = vmatprep.subr.bf16.mxu0 %v2618_v7 }
0x1014   : > { %2365 = vmatprep.mubr.msk.f32.mxu0 %vm2619_vm7, %v2620_v20 }
0x1016   : > { %2459 = vmatpush3.bf16.msra.mxu0 %v3047_v1 }
0x10dc   : > { %v2334_v37 = vpop.f32.mrb[22].mxu0 }
0x10dd   : > { %v1755_v46 = vpop.f32.mrb[23].mxu0 }
0x10de   : > { %v1774_v47 = vadd.f32 %v2334_v37, %v1755_v46 }
0x10e6   : > { %v2337_v48 = vpop.f32.mrb[24].mxu0 }
0x10e7   : > { %v1765_v30 = vpop.f32.mrb[25].mxu0 }
0x10e8   : > { %v1775_v31 = vadd.f32 %v1774_v47, %v1765_v30 }
0x10ea   : > { %v1776_v9 = vadd.f32 %v2337_v48, %v1775_v31 }
0x10ec   : > { %v1777_v49 = vadd.f32 %v1776_v9, %v3066_v32 }
0x10ee   : > { %v1778_v41 = vadd.f32 %v2960_v50, %v1777_v49 }
0x10f0   : > { %v1779_v55 = vsel %vm218_vm0, %v1778_v41, 0.0 }
0x10f1   : > { %1780 = vadd.xlane.f32.xlu1 %v1779_v55 }
0x117e   : > { %v1781_v7 = vpop.xlane.xlu1 %1780 }
0x117f   : > { %v1782_v54 = vmul.f32 0.03125, %v1781_v7 }
0x1181   : > { %v1783_v33 = vsub.f32 %v1778_v41, %v1782_v54 }
0x1183   : > { %v1784_v20 = vmul.f32 %v1783_v33, %v1783_v33 }
0x1185   : > { %v1785_v1 = vsel %vm218_vm0, %v1784_v20, 0.0 }
0x1186   : > { %1786 = vadd.xlane.f32.xlu0 %v1785_v1 }
0x1213   : > { %v1787_v56 = vpop.xlane.xlu0 %1786 }
0x1214   : > { %v1788_v57 = vmul.f32 0.03125, %v1787_v56 }
0x1216   : > { %v1789_v34 = vadd.f32 1e-05, %v1788_v57 }
0x1218   : > { %2546 = vrsqrt.f32 %v1789_v34 }
0x1222   : > { %v2547_v35 = vpop.eup %2546 }
0x1223   : > { %v1791_v32 = vmul.f32 %v2547_v35, %v1783_v33 }
0x1225   : > { %v1792_v50 = vmul.f32 %v3029_v42, %v1791_v32 }
0x1227   : > { %v1793_v62 = vadd.f32 %v3034_v51, %v1792_v50 }
0x1229   : > { %2347 = vmatmul.mubr.msk.f32.vlgmr.msra.gmra.mrb[26].mxu1 %vm218_vm0, %v1793_v62 }
0x12fc   : > { %v1863_v2 = vpop.f32.mrb[26].mxu1 }
0x12fd   : > { %v1864_v43 = vadd.f32 %v3054_v10, %v1863_v2  ;;  %v2348_v3 = vpop.f32.mrb[27].mxu1 }
0x12ff   : > { %v1867_v44 = vmax.f32 %v1864_v43, 0.0 }
0x1301   : > { %2366 = vmatmul.mubr.msk.f32.vlgmr.msra.gmra.mrb[26].mxu0 %vm246_vm1, %v1867_v44 }
0x13d4   : > { %v1937_v52 = vpop.f32.mrb[26].mxu0 }
0x13d5   : > { %v1941_v53 = vadd.f32 %v1937_v52, %v1778_v41  ;;  %v2367_v42 = vpop.f32.mrb[27].mxu0 }
0x13d7   : > { %v1942_v51 = vadd.f32 %v3062_v18, %v1941_v53 }
0x13d9   : > { %1943 = vst.msk [vmem:[%s134_s17] sm:$0xff] %vm218_vm0, %v1942_v51 }
0x13da   : > { %2561 = shalt.err (!%p2558_p3)
}
0x13db   : > { %s2562_s4 = scalar_lea.hbm %s3192_s27, 128  ;;  %s2566_s7 = scalar_lea.hbm %s3237_s2, 256 }
0x13dc   : > { %p2563_p4 = scmp.ne.s32.totalorder %s3192_s27, %s2562_s4  ;;  %p2567_p9 = scmp.lt.u32.totalorder %s3192_s27, %s3237_s2 }
0x13dd   : > { %p2568_p10 = scmp.lt.u32.totalorder %s2566_s7, %s2562_s4  ;;  %p2570_p12 = scmp.lt.u32.totalorder %s2562_s4, %s3192_s27 }
0x13de   : > { %p2564_p7 = pnand %p2563_p4, %p2675_p5 }
0x13df   : > { %p2569_p11 = por %p2568_p10, %p2567_p9 }
0x13e0   : > { %p2565_p8 = pneg %p2564_p7 }
0x13e1   : > { %p2571_p13 = por %p2570_p12, %p2569_p11 }
0x13e3   : > { %p2572_p0 = pnand %p2571_p13, %p2565_p8 }
0x13e5   : > { %2575 = shalt.err (!%p2572_p0)
}
0x13e6   : > { %2460 = dma.vmem_to_hbm [thread:$0]  (%p2675_p5), %s3194_s21, 128, %s3192_s27, %s1945_s28  }
0x13e7 PF: > { %p2466_p1 = scmp.ge.s32.totalorder %s2610_s12, 2  ;;  %s1970_s25 = sand.u32 1, %s2598_s9  }
0x13e8   : > { %s1971_s8 = scalar_lea.sflag [#allocation3], %s1970_s25 }
0x13e9   : > { %p2463_p2 = pnand %p2466_p1, %p2679_p6 }
0x13eb   : > { %2593 = dma.done.wait (!%p2463_p2), %s1971_s8, 128  }
0x13ec   : > { %2595 = vsyncadd (!%p2463_p2), %s1971_s8, 4294967168  ;;  %p12_p3 = scmp.ge.s32.totalorder %s2662_s15, 4   ;;  %s3242_s9 = smov %s2602_s10 }
0x13ed   : > { %s3243_s10 = smov %s2606_s11  ;;  %s3244_s11 = smov %s2673_s18 }
0x13ee   : > { %s3245_s12 = smov %s2662_s15  ;;  %14 = sbr.rel (!%p12_p3) target bundleno = 3 (0x3), region = 63 }
0x13f5   :  { %1976 = vsyncpa [#allocation3], 1 }
0x13f6   :  { %1978 = vsyncpa [#allocation3 + $0x1], 1 }

</bundles_post_ra>
